<compile_context>
chip_gen: v7x
topology: tpu7x:2x2x1
jax: 0.10.0
libtpu: 0.0.40
codegen_flags: <defaults>
</compile_context>

<pallas_src>
import math
import functools

import jax
import jax.numpy as jnp
from jax import lax
from jax.experimental import pallas as pl
from jax.experimental.pallas import tpu as pltpu


# ----------------------------------------------------------------------------
# Config (fields the PyTorch module reads)
# ----------------------------------------------------------------------------
class Config:
    hidden_size = 32
    num_attention_heads = 4
    attention_probs_dropout_prob = 0.0   # eval mode -> dropout is identity
    kernel_size = 4                      # nn.MaxPool1d kernel over the sequence axis
    stride = 4                           # nn.MaxPool1d stride


# ----------------------------------------------------------------------------
# Fused Pallas kernel: one program = `batch_block` batch elements' full forward
# ----------------------------------------------------------------------------
def _maxpool_attn_kernel(x_ref, w_ref, b_ref, m_ref, o_ref, *,
                         batch_block, seq_len, num_heads, head_dim,
                         kernel_size, stride, pooled_len):
    """
    x_ref: (Bb*T, Hs)    flattened hidden states of this batch block
    w_ref: (Hs, 3*Hs)    [Wq^T * 1/sqrt(d) | Wk^T | Wv^T]
    b_ref: (1, 3*Hs)     [bq * 1/sqrt(d) | bk | bv]
    m_ref: (Bb*T, 1)     additive mask (0 attend / -10000 masked), broadcast over features
    o_ref: (Bb*T, Hs)    merged-head context layer
    """
    Hs = w_ref.shape[0]
    T = seq_len
    Tp = pooled_len

    # One fused Q/K/V projection for the whole batch block (single MXU matmul).
    qkv = (jnp.dot(x_ref[...], w_ref[...], preferred_element_type=jnp.float32)
           + b_ref[...])                                             # (Bb*T, 3Hs)

    q_all = qkv[:, :Hs]                                              # 1/sqrt(d) already folded in
    # K|V as one fused slab: one mask add + one pooling pass covers both.
    kv_all = qkv[:, Hs:] + m_ref[...]                                # (Bb*T, 2Hs)

    if kernel_size == stride and T == Tp * stride:
        # Non-overlapping pooling of the whole block in a single sublane max reduction.
        pooled_all = jnp.max(
            kv_all.reshape(batch_block * Tp, kernel_size, 2 * Hs), axis=1)   # (Bb*Tp, 2Hs)
    else:
        # Fallback: explicit (possibly overlapping) windows, per batch element.
        rows = []
        for b in range(batch_block):
            kv_b = kv_all[b * T:(b + 1) * T, :]
            rows += [jnp.max(kv_b[j * stride:j * stride + kernel_size, :],
                             axis=0, keepdims=True) for j in range(Tp)]
        pooled_all = jnp.concatenate(rows, axis=0)                    # (Bb*Tp, 2Hs)

    # Per-(batch, head) scaled dot-product attention.  Both loops are tiny static unrolls.
    contract_last = (((1,), (1,)), ((), ()))      # contract last axes of both -> no K^T / XLU
    for b in range(batch_block):
        q_b = q_all[b * T:(b + 1) * T, :]                             # (T, Hs)
        kp_b = pooled_all[b * Tp:(b + 1) * Tp, :Hs]                   # (Tp, Hs)
        vp_b = pooled_all[b * Tp:(b + 1) * Tp, Hs:]                   # (Tp, Hs)
        for h in range(num_heads):
            lo = h * head_dim
            hi = lo + head_dim
            s = lax.dot_general(q_b[:, lo:hi], kp_b[:, lo:hi], contract_last,
                                preferred_element_type=jnp.float32)   # (T, Tp)
            s = s - jnp.max(s, axis=-1, keepdims=True)
            p = jnp.exp(s)
            p = p * pl.reciprocal(jnp.sum(p, axis=-1, keepdims=True), approx=True)
            # attention-probs dropout = identity (eval mode)
            ctx = jnp.dot(p, vp_b[:, lo:hi], preferred_element_type=jnp.float32)  # (T, d)
            # Head merge is free: each head writes straight into its lane slice of the output.
            o_ref[b * T:(b + 1) * T, lo:hi] = ctx.astype(o_ref.dtype)


# ----------------------------------------------------------------------------
# Module wrapper (mirrors MaxPoolingSelfAttention.forward)
# ----------------------------------------------------------------------------
def maxpool_self_attention(hidden_states, attention_mask, params, config):
    B, T, Hs = hidden_states.shape
    H = config.num_attention_heads
    d = Hs // H
    Ks, St = config.kernel_size, config.stride
    Tp = (T - Ks) // St + 1
    assert Tp >= 1

    # Fold 1/sqrt(d) into the Q projection; concatenate so the kernel does one MXU matmul.
    scale = 1.0 / math.sqrt(d)
    w_all = jnp.concatenate(
        [params['q_w'].T * scale, params['k_w'].T, params['v_w'].T], axis=1)   # (Hs, 3Hs)
    b_all = jnp.concatenate(
        [params['q_b'] * scale, params['k_b'], params['v_b']]).reshape(1, 3 * Hs)

    if attention_mask is None:
        add_mask = jnp.zeros((B * T, 1), jnp.float32)
    else:
        # standard additive BERT mask (B, 1, 1, T): keep the raw additive values
        add_mask = attention_mask[:, 0, 0, :].reshape(B * T, 1).astype(jnp.float32)

    # v5e/v6e are single-TensorCore: fold the whole batch into ONE program (no extra
    # per-grid-step overhead, bigger projection M).  v7x has 2 TCs: split the batch into
    # two "parallel" programs so the second core isn't idle.
    try:
        kind = jax.devices()[0].device_kind.lower()
    except Exception:
        kind = ""
    dual_tc = ("v7" in kind) or ("7x" in kind)
    n_blocks = 2 if (dual_tc and B >= 2 and B % 2 == 0) else 1
    Bb = B // n_blocks

    x2 = hidden_states.reshape(B * T, Hs)

    kernel = functools.partial(
        _maxpool_attn_kernel, batch_block=Bb, seq_len=T, num_heads=H, head_dim=d,
        kernel_size=Ks, stride=St, pooled_len=Tp)

    out = pl.pallas_call(
        kernel,
        out_shape=jax.ShapeDtypeStruct((B * T, Hs), hidden_states.dtype),
        grid=(n_blocks,),
        in_specs=[
            pl.BlockSpec((Bb * T, Hs), lambda g: (g, 0)),
            pl.BlockSpec((Hs, 3 * Hs), lambda g: (0, 0)),
            pl.BlockSpec((1, 3 * Hs), lambda g: (0, 0)),
            pl.BlockSpec((Bb * T, 1), lambda g: (g, 0)),
        ],
        out_specs=pl.BlockSpec((Bb * T, Hs), lambda g: (g, 0)),
        compiler_params=pltpu.CompilerParams(dimension_semantics=("parallel",)),
    )(x2, w_all, b_all, add_mask)
    return (out.reshape(B, T, Hs),)


# ----------------------------------------------------------------------------
# Pure-JAX reference (for the runtime correctness check)
# ----------------------------------------------------------------------------
def _reference_forward(hidden_states, attention_mask, params, config):
    B, T, Hs = hidden_states.shape
    H = config.num_attention_heads
    d = Hs // H
    Ks, St = config.kernel_size, config.stride
    Tp = (T - Ks) // St + 1

    def lin(x, w, b):
        return x @ w.T + b

    def heads(x):
        return x.reshape(B, T, H, d).transpose(0, 2, 1, 3)           # (B, H, T, d)

    q = heads(lin(hidden_states, params['q_w'], params['q_b']))
    k = heads(lin(hidden_states, params['k_w'], params['k_b']))
    v = heads(lin(hidden_states, params['v_w'], params['v_b']))

    if attention_mask is not None:
        m = jnp.swapaxes(attention_mask, -1, -2)                     # (B, 1, T, 1)
        k = k + m
        v = v + m

    def pool(x):                                                     # (B,H,T,d)->(B,H,Tp,d)
        return jnp.stack([jnp.max(x[:, :, j * St:j * St + Ks, :], axis=2)
                          for j in range(Tp)], axis=2)

    kp, vp = pool(k), pool(v)
    s = jnp.einsum('bhtd,bhpd->bhtp', q, kp) / math.sqrt(d)
    p = jax.nn.softmax(s, axis=-1)
    ctx = jnp.einsum('bhtp,bhpd->bhtd', p, vp)
    return ctx.transpose(0, 2, 1, 3).reshape(B, T, Hs)


# ----------------------------------------------------------------------------
# Parameter init (mirrors nn.Linear default init, PyTorch (out, in) weight layout)
# ----------------------------------------------------------------------------
def init_params(key, hidden_size):
    ks = jax.random.split(key, 6)
    bound = 1.0 / math.sqrt(hidden_size)

    def lin(kw, kb):
        w = jax.random.uniform(kw, (hidden_size, hidden_size), jnp.float32, -bound, bound)
        b = jax.random.uniform(kb, (hidden_size,), jnp.float32, -bound, bound)
        return w, b

    q_w, q_b = lin(ks[0], ks[1])
    k_w, k_b = lin(ks[2], ks[3])
    v_w, v_b = lin(ks[4], ks[5])
    return dict(q_w=q_w, q_b=q_b, k_w=k_w, k_b=k_b, v_w=v_w, v_b=v_b)


# ----------------------------------------------------------------------------
if __name__ == "__main__":
    cfg = Config()
    B, T = 2, 32

    key = jax.random.PRNGKey(0)
    k_param, k_x = jax.random.split(key)

    params = init_params(k_param, cfg.hidden_size)
    hidden_states = jax.random.normal(k_x, (B, T, cfg.hidden_size), dtype=jnp.float32)

    # Additive BERT-style mask (B, 1, 1, T): batch 0 fully attends; batch 1 masks every
    # odd position (-10000) so the mask-add + max-pool interaction is exercised while every
    # pooling window keeps at least one live position (values stay O(1) -> tight tolerance).
    pos = jnp.arange(T)
    mask_b1 = jnp.where((pos % 2) == 1, -10000.0, 0.0).astype(jnp.float32)
    attention_mask = jnp.stack([jnp.zeros((T,), jnp.float32), mask_b1]).reshape(B, 1, 1, T)

    (out,) = maxpool_self_attention(hidden_states, attention_mask, params, cfg)
    out = jax.block_until_ready(out)

    assert out.shape == (B, T, cfg.hidden_size), out.shape
    assert bool(jnp.all(jnp.isfinite(out)))

    ref = _reference_forward(hidden_states, attention_mask, params, cfg)
    # Exact-division f32 would allow ~1e-5, but the kernel intentionally uses the EUP
    # approximate reciprocal for the softmax denominator (perf), which bounds agreement at
    # ~1e-3 relative.  3e-3 on a mixed rel/abs metric still catches any wiring, pooling,
    # masking or head-merge bug (those produce O(0.1-1) deviations).
    err = float(jnp.max(jnp.abs(out - ref) / (1.0 + jnp.abs(ref))))
    assert err < 3e-3, f"kernel/reference mismatch: max mixed rel/abs err {err}"

    print("KERNEL_OK")
</pallas_src>

<mosaic_0001>
module attributes {stable_mosaic.version = 11 : i64} {
  func.func @_maxpool_attn_kernel(%arg0: i32, %arg1: memref<64x32xf32, #tpu.memory_space<vmem>>, %arg2: memref<32x96xf32, #tpu.memory_space<vmem>>, %arg3: memref<1x96xf32, #tpu.memory_space<vmem>>, %arg4: memref<64x1xf32, #tpu.memory_space<vmem>>, %arg5: memref<64x32xf32, #tpu.memory_space<vmem>>) attributes {dimension_semantics = [#tpu.dimension_semantics<parallel>], iteration_bounds = array<i64: 1>, scalar_prefetch = 0 : i64, scratch_operands = 0 : i64, tpu.core_type = #tpu.core_type<tc>, window_params = [{transform_indices = @transform_0, window_bounds = array<i64: 64, 32>}, {pipeline_mode = #tpu.pipeline_mode<synchronous>, transform_indices = @transform_1, window_bounds = array<i64: 32, 96>}, {pipeline_mode = #tpu.pipeline_mode<synchronous>, transform_indices = @transform_2, window_bounds = array<i64: 1, 96>}, {transform_indices = @transform_3, window_bounds = array<i64: 64, 1>}, {transform_indices = @transform_4, window_bounds = array<i64: 64, 32>}]} {
    %c0 = arith.constant 0 : index
    %c0_0 = arith.constant 0 : index
    %0 = vector.load %arg1[%c0, %c0_0] : memref<64x32xf32, #tpu.memory_space<vmem>>, vector<64x32xf32>
    %c0_1 = arith.constant 0 : index
    %c0_2 = arith.constant 0 : index
    %1 = vector.load %arg2[%c0_1, %c0_2] : memref<32x96xf32, #tpu.memory_space<vmem>>, vector<32x96xf32>
    %cst = arith.constant dense<0.000000e+00> : vector<64x96xf32>
    %2 = tpu.matmul %0, %1, %cst {dimension_numbers = #tpu.dot_dimension_numbers<[1], [0], [0], [1], [0, 0, 1, 1], [], []>} : vector<64x32xf32>, vector<32x96xf32>, vector<64x96xf32> -> vector<64x96xf32>
    %c0_3 = arith.constant 0 : index
    %c0_4 = arith.constant 0 : index
    %3 = vector.load %arg3[%c0_3, %c0_4] : memref<1x96xf32, #tpu.memory_space<vmem>>, vector<1x96xf32>
    %4 = vector.broadcast %3 : vector<1x96xf32> to vector<64x96xf32>
    %5 = arith.addf %2, %4 : vector<64x96xf32>
    %6 = vector.extract_strided_slice %5 {offsets = [0, 0], sizes = [64, 32], strides = [1, 1]} : vector<64x96xf32> to vector<64x32xf32>
    %7 = vector.extract_strided_slice %5 {offsets = [0, 32], sizes = [64, 64], strides = [1, 1]} : vector<64x96xf32> to vector<64x64xf32>
    %c0_5 = arith.constant 0 : index
    %c0_6 = arith.constant 0 : index
    %8 = vector.load %arg4[%c0_5, %c0_6] : memref<64x1xf32, #tpu.memory_space<vmem>>, vector<64x1xf32>
    %9 = vector.broadcast %8 : vector<64x1xf32> to vector<64x64xf32>
    %10 = arith.addf %7, %9 : vector<64x64xf32>
    %11 = vector.shape_cast %10 : vector<64x64xf32> to vector<16x4x64xf32>
    %cst_7 = arith.constant dense<0xFF800000> : vector<16x64xf32>
    %12 = vector.multi_reduction <maximumf>, %11, %cst_7 [1] : vector<16x4x64xf32> to vector<16x64xf32>
    %13 = vector.extract_strided_slice %6 {offsets = [0, 0], sizes = [32, 32], strides = [1, 1]} : vector<64x32xf32> to vector<32x32xf32>
    %14 = vector.extract_strided_slice %12 {offsets = [0, 0], sizes = [8, 32], strides = [1, 1]} : vector<16x64xf32> to vector<8x32xf32>
    %15 = vector.extract_strided_slice %12 {offsets = [0, 32], sizes = [8, 32], strides = [1, 1]} : vector<16x64xf32> to vector<8x32xf32>
    %16 = vector.extract_strided_slice %13 {offsets = [0, 0], sizes = [32, 8], strides = [1, 1]} : vector<32x32xf32> to vector<32x8xf32>
    %17 = vector.extract_strided_slice %14 {offsets = [0, 0], sizes = [8, 8], strides = [1, 1]} : vector<8x32xf32> to vector<8x8xf32>
    %cst_8 = arith.constant dense<0.000000e+00> : vector<32x8xf32>
    %18 = tpu.matmul %16, %17, %cst_8 {dimension_numbers = #tpu.dot_dimension_numbers<[1], [1], [0], [0], [0, 0, 1, 0], [], []>} : vector<32x8xf32>, vector<8x8xf32>, vector<32x8xf32> -> vector<32x8xf32>
    %cst_9 = arith.constant dense<0xFF800000> : vector<32xf32>
    %19 = vector.multi_reduction <maximumf>, %18, %cst_9 [1] : vector<32x8xf32> to vector<32xf32>
    %20 = vector.shape_cast %19 : vector<32xf32> to vector<32x1xf32>
    %21 = vector.broadcast %20 : vector<32x1xf32> to vector<32x8xf32>
    %22 = arith.subf %18, %21 : vector<32x8xf32>
    %23 = math.exp %22 : vector<32x8xf32>
    %cst_10 = arith.constant dense<0.000000e+00> : vector<32xf32>
    %24 = vector.multi_reduction <add>, %23, %cst_10 [1] : vector<32x8xf32> to vector<32xf32>
    %25 = vector.shape_cast %24 : vector<32xf32> to vector<32x1xf32>
    %26 = tpu.reciprocal %25 {approx = true} : vector<32x1xf32> -> vector<32x1xf32>
    %27 = vector.broadcast %26 : vector<32x1xf32> to vector<32x8xf32>
    %28 = arith.mulf %23, %27 : vector<32x8xf32>
    %29 = vector.extract_strided_slice %15 {offsets = [0, 0], sizes = [8, 8], strides = [1, 1]} : vector<8x32xf32> to vector<8x8xf32>
    %cst_11 = arith.constant dense<0.000000e+00> : vector<32x8xf32>
    %30 = tpu.matmul %28, %29, %cst_11 {dimension_numbers = #tpu.dot_dimension_numbers<[1], [0], [0], [1], [0, 0, 1, 1], [], []>} : vector<32x8xf32>, vector<8x8xf32>, vector<32x8xf32> -> vector<32x8xf32>
    %c0_12 = arith.constant 0 : index
    %c0_13 = arith.constant 0 : index
    %31 = vector.load %arg5[%c0_12, %c0_13] : memref<64x32xf32, #tpu.memory_space<vmem>>, vector<32x8xf32>
    tpu.vector_store %arg5[%c0_12, %c0_13], %30 {strides = array<i32>} : memref<64x32xf32, #tpu.memory_space<vmem>>, vector<32x8xf32>,
    %32 = vector.extract_strided_slice %13 {offsets = [0, 8], sizes = [32, 8], strides = [1, 1]} : vector<32x32xf32> to vector<32x8xf32>
    %33 = vector.extract_strided_slice %14 {offsets = [0, 8], sizes = [8, 8], strides = [1, 1]} : vector<8x32xf32> to vector<8x8xf32>
    %cst_14 = arith.constant dense<0.000000e+00> : vector<32x8xf32>
    %34 = tpu.matmul %32, %33, %cst_14 {dimension_numbers = #tpu.dot_dimension_numbers<[1], [1], [0], [0], [0, 0, 1, 0], [], []>} : vector<32x8xf32>, vector<8x8xf32>, vector<32x8xf32> -> vector<32x8xf32>
    %cst_15 = arith.constant dense<0xFF800000> : vector<32xf32>
    %35 = vector.multi_reduction <maximumf>, %34, %cst_15 [1] : vector<32x8xf32> to vector<32xf32>
    %36 = vector.shape_cast %35 : vector<32xf32> to vector<32x1xf32>
    %37 = vector.broadcast %36 : vector<32x1xf32> to vector<32x8xf32>
    %38 = arith.subf %34, %37 : vector<32x8xf32>
    %39 = math.exp %38 : vector<32x8xf32>
    %cst_16 = arith.constant dense<0.000000e+00> : vector<32xf32>
    %40 = vector.multi_reduction <add>, %39, %cst_16 [1] : vector<32x8xf32> to vector<32xf32>
    %41 = vector.shape_cast %40 : vector<32xf32> to vector<32x1xf32>
    %42 = tpu.reciprocal %41 {approx = true} : vector<32x1xf32> -> vector<32x1xf32>
    %43 = vector.broadcast %42 : vector<32x1xf32> to vector<32x8xf32>
    %44 = arith.mulf %39, %43 : vector<32x8xf32>
    %45 = vector.extract_strided_slice %15 {offsets = [0, 8], sizes = [8, 8], strides = [1, 1]} : vector<8x32xf32> to vector<8x8xf32>
    %cst_17 = arith.constant dense<0.000000e+00> : vector<32x8xf32>
    %46 = tpu.matmul %44, %45, %cst_17 {dimension_numbers = #tpu.dot_dimension_numbers<[1], [0], [0], [1], [0, 0, 1, 1], [], []>} : vector<32x8xf32>, vector<8x8xf32>, vector<32x8xf32> -> vector<32x8xf32>
    %c0_18 = arith.constant 0 : index
    %c8 = arith.constant 8 : index
    %47 = vector.load %arg5[%c0_18, %c8] : memref<64x32xf32, #tpu.memory_space<vmem>>, vector<32x8xf32>
    tpu.vector_store %arg5[%c0_18, %c8], %46 {strides = array<i32>} : memref<64x32xf32, #tpu.memory_space<vmem>>, vector<32x8xf32>,
    %48 = vector.extract_strided_slice %13 {offsets = [0, 16], sizes = [32, 8], strides = [1, 1]} : vector<32x32xf32> to vector<32x8xf32>
    %49 = vector.extract_strided_slice %14 {offsets = [0, 16], sizes = [8, 8], strides = [1, 1]} : vector<8x32xf32> to vector<8x8xf32>
    %cst_19 = arith.constant dense<0.000000e+00> : vector<32x8xf32>
    %50 = tpu.matmul %48, %49, %cst_19 {dimension_numbers = #tpu.dot_dimension_numbers<[1], [1], [0], [0], [0, 0, 1, 0], [], []>} : vector<32x8xf32>, vector<8x8xf32>, vector<32x8xf32> -> vector<32x8xf32>
    %cst_20 = arith.constant dense<0xFF800000> : vector<32xf32>
    %51 = vector.multi_reduction <maximumf>, %50, %cst_20 [1] : vector<32x8xf32> to vector<32xf32>
    %52 = vector.shape_cast %51 : vector<32xf32> to vector<32x1xf32>
    %53 = vector.broadcast %52 : vector<32x1xf32> to vector<32x8xf32>
    %54 = arith.subf %50, %53 : vector<32x8xf32>
    %55 = math.exp %54 : vector<32x8xf32>
    %cst_21 = arith.constant dense<0.000000e+00> : vector<32xf32>
    %56 = vector.multi_reduction <add>, %55, %cst_21 [1] : vector<32x8xf32> to vector<32xf32>
    %57 = vector.shape_cast %56 : vector<32xf32> to vector<32x1xf32>
    %58 = tpu.reciprocal %57 {approx = true} : vector<32x1xf32> -> vector<32x1xf32>
    %59 = vector.broadcast %58 : vector<32x1xf32> to vector<32x8xf32>
    %60 = arith.mulf %55, %59 : vector<32x8xf32>
    %61 = vector.extract_strided_slice %15 {offsets = [0, 16], sizes = [8, 8], strides = [1, 1]} : vector<8x32xf32> to vector<8x8xf32>
    %cst_22 = arith.constant dense<0.000000e+00> : vector<32x8xf32>
    %62 = tpu.matmul %60, %61, %cst_22 {dimension_numbers = #tpu.dot_dimension_numbers<[1], [0], [0], [1], [0, 0, 1, 1], [], []>} : vector<32x8xf32>, vector<8x8xf32>, vector<32x8xf32> -> vector<32x8xf32>
    %c0_23 = arith.constant 0 : index
    %c16 = arith.constant 16 : index
    %63 = vector.load %arg5[%c0_23, %c16] : memref<64x32xf32, #tpu.memory_space<vmem>>, vector<32x8xf32>
    tpu.vector_store %arg5[%c0_23, %c16], %62 {strides = array<i32>} : memref<64x32xf32, #tpu.memory_space<vmem>>, vector<32x8xf32>,
    %64 = vector.extract_strided_slice %13 {offsets = [0, 24], sizes = [32, 8], strides = [1, 1]} : vector<32x32xf32> to vector<32x8xf32>
    %65 = vector.extract_strided_slice %14 {offsets = [0, 24], sizes = [8, 8], strides = [1, 1]} : vector<8x32xf32> to vector<8x8xf32>
    %cst_24 = arith.constant dense<0.000000e+00> : vector<32x8xf32>
    %66 = tpu.matmul %64, %65, %cst_24 {dimension_numbers = #tpu.dot_dimension_numbers<[1], [1], [0], [0], [0, 0, 1, 0], [], []>} : vector<32x8xf32>, vector<8x8xf32>, vector<32x8xf32> -> vector<32x8xf32>
    %cst_25 = arith.constant dense<0xFF800000> : vector<32xf32>
    %67 = vector.multi_reduction <maximumf>, %66, %cst_25 [1] : vector<32x8xf32> to vector<32xf32>
    %68 = vector.shape_cast %67 : vector<32xf32> to vector<32x1xf32>
    %69 = vector.broadcast %68 : vector<32x1xf32> to vector<32x8xf32>
    %70 = arith.subf %66, %69 : vector<32x8xf32>
    %71 = math.exp %70 : vector<32x8xf32>
    %cst_26 = arith.constant dense<0.000000e+00> : vector<32xf32>
    %72 = vector.multi_reduction <add>, %71, %cst_26 [1] : vector<32x8xf32> to vector<32xf32>
    %73 = vector.shape_cast %72 : vector<32xf32> to vector<32x1xf32>
    %74 = tpu.reciprocal %73 {approx = true} : vector<32x1xf32> -> vector<32x1xf32>
    %75 = vector.broadcast %74 : vector<32x1xf32> to vector<32x8xf32>
    %76 = arith.mulf %71, %75 : vector<32x8xf32>
    %77 = vector.extract_strided_slice %15 {offsets = [0, 24], sizes = [8, 8], strides = [1, 1]} : vector<8x32xf32> to vector<8x8xf32>
    %cst_27 = arith.constant dense<0.000000e+00> : vector<32x8xf32>
    %78 = tpu.matmul %76, %77, %cst_27 {dimension_numbers = #tpu.dot_dimension_numbers<[1], [0], [0], [1], [0, 0, 1, 1], [], []>} : vector<32x8xf32>, vector<8x8xf32>, vector<32x8xf32> -> vector<32x8xf32>
    %c0_28 = arith.constant 0 : index
    %c24 = arith.constant 24 : index
    %79 = vector.load %arg5[%c0_28, %c24] : memref<64x32xf32, #tpu.memory_space<vmem>>, vector<32x8xf32>
    tpu.vector_store %arg5[%c0_28, %c24], %78 {strides = array<i32>} : memref<64x32xf32, #tpu.memory_space<vmem>>, vector<32x8xf32>,
    %80 = vector.extract_strided_slice %6 {offsets = [32, 0], sizes = [32, 32], strides = [1, 1]} : vector<64x32xf32> to vector<32x32xf32>
    %81 = vector.extract_strided_slice %12 {offsets = [8, 0], sizes = [8, 32], strides = [1, 1]} : vector<16x64xf32> to vector<8x32xf32>
    %82 = vector.extract_strided_slice %12 {offsets = [8, 32], sizes = [8, 32], strides = [1, 1]} : vector<16x64xf32> to vector<8x32xf32>
    %83 = vector.extract_strided_slice %80 {offsets = [0, 0], sizes = [32, 8], strides = [1, 1]} : vector<32x32xf32> to vector<32x8xf32>
    %84 = vector.extract_strided_slice %81 {offsets = [0, 0], sizes = [8, 8], strides = [1, 1]} : vector<8x32xf32> to vector<8x8xf32>
    %cst_29 = arith.constant dense<0.000000e+00> : vector<32x8xf32>
    %85 = tpu.matmul %83, %84, %cst_29 {dimension_numbers = #tpu.dot_dimension_numbers<[1], [1], [0], [0], [0, 0, 1, 0], [], []>} : vector<32x8xf32>, vector<8x8xf32>, vector<32x8xf32> -> vector<32x8xf32>
    %cst_30 = arith.constant dense<0xFF800000> : vector<32xf32>
    %86 = vector.multi_reduction <maximumf>, %85, %cst_30 [1] : vector<32x8xf32> to vector<32xf32>
    %87 = vector.shape_cast %86 : vector<32xf32> to vector<32x1xf32>
    %88 = vector.broadcast %87 : vector<32x1xf32> to vector<32x8xf32>
    %89 = arith.subf %85, %88 : vector<32x8xf32>
    %90 = math.exp %89 : vector<32x8xf32>
    %cst_31 = arith.constant dense<0.000000e+00> : vector<32xf32>
    %91 = vector.multi_reduction <add>, %90, %cst_31 [1] : vector<32x8xf32> to vector<32xf32>
    %92 = vector.shape_cast %91 : vector<32xf32> to vector<32x1xf32>
    %93 = tpu.reciprocal %92 {approx = true} : vector<32x1xf32> -> vector<32x1xf32>
    %94 = vector.broadcast %93 : vector<32x1xf32> to vector<32x8xf32>
    %95 = arith.mulf %90, %94 : vector<32x8xf32>
    %96 = vector.extract_strided_slice %82 {offsets = [0, 0], sizes = [8, 8], strides = [1, 1]} : vector<8x32xf32> to vector<8x8xf32>
    %cst_32 = arith.constant dense<0.000000e+00> : vector<32x8xf32>
    %97 = tpu.matmul %95, %96, %cst_32 {dimension_numbers = #tpu.dot_dimension_numbers<[1], [0], [0], [1], [0, 0, 1, 1], [], []>} : vector<32x8xf32>, vector<8x8xf32>, vector<32x8xf32> -> vector<32x8xf32>
    %c32 = arith.constant 32 : index
    %c0_33 = arith.constant 0 : index
    %98 = vector.load %arg5[%c32, %c0_33] : memref<64x32xf32, #tpu.memory_space<vmem>>, vector<32x8xf32>
    tpu.vector_store %arg5[%c32, %c0_33], %97 {strides = array<i32>} : memref<64x32xf32, #tpu.memory_space<vmem>>, vector<32x8xf32>,
    %99 = vector.extract_strided_slice %80 {offsets = [0, 8], sizes = [32, 8], strides = [1, 1]} : vector<32x32xf32> to vector<32x8xf32>
    %100 = vector.extract_strided_slice %81 {offsets = [0, 8], sizes = [8, 8], strides = [1, 1]} : vector<8x32xf32> to vector<8x8xf32>
    %cst_34 = arith.constant dense<0.000000e+00> : vector<32x8xf32>
    %101 = tpu.matmul %99, %100, %cst_34 {dimension_numbers = #tpu.dot_dimension_numbers<[1], [1], [0], [0], [0, 0, 1, 0], [], []>} : vector<32x8xf32>, vector<8x8xf32>, vector<32x8xf32> -> vector<32x8xf32>
    %cst_35 = arith.constant dense<0xFF800000> : vector<32xf32>
    %102 = vector.multi_reduction <maximumf>, %101, %cst_35 [1] : vector<32x8xf32> to vector<32xf32>
    %103 = vector.shape_cast %102 : vector<32xf32> to vector<32x1xf32>
    %104 = vector.broadcast %103 : vector<32x1xf32> to vector<32x8xf32>
    %105 = arith.subf %101, %104 : vector<32x8xf32>
    %106 = math.exp %105 : vector<32x8xf32>
    %cst_36 = arith.constant dense<0.000000e+00> : vector<32xf32>
    %107 = vector.multi_reduction <add>, %106, %cst_36 [1] : vector<32x8xf32> to vector<32xf32>
    %108 = vector.shape_cast %107 : vector<32xf32> to vector<32x1xf32>
    %109 = tpu.reciprocal %108 {approx = true} : vector<32x1xf32> -> vector<32x1xf32>
    %110 = vector.broadcast %109 : vector<32x1xf32> to vector<32x8xf32>
    %111 = arith.mulf %106, %110 : vector<32x8xf32>
    %112 = vector.extract_strided_slice %82 {offsets = [0, 8], sizes = [8, 8], strides = [1, 1]} : vector<8x32xf32> to vector<8x8xf32>
    %cst_37 = arith.constant dense<0.000000e+00> : vector<32x8xf32>
    %113 = tpu.matmul %111, %112, %cst_37 {dimension_numbers = #tpu.dot_dimension_numbers<[1], [0], [0], [1], [0, 0, 1, 1], [], []>} : vector<32x8xf32>, vector<8x8xf32>, vector<32x8xf32> -> vector<32x8xf32>
    %c32_38 = arith.constant 32 : index
    %c8_39 = arith.constant 8 : index
    %114 = vector.load %arg5[%c32_38, %c8_39] : memref<64x32xf32, #tpu.memory_space<vmem>>, vector<32x8xf32>
    tpu.vector_store %arg5[%c32_38, %c8_39], %113 {strides = array<i32>} : memref<64x32xf32, #tpu.memory_space<vmem>>, vector<32x8xf32>,
    %115 = vector.extract_strided_slice %80 {offsets = [0, 16], sizes = [32, 8], strides = [1, 1]} : vector<32x32xf32> to vector<32x8xf32>
    %116 = vector.extract_strided_slice %81 {offsets = [0, 16], sizes = [8, 8], strides = [1, 1]} : vector<8x32xf32> to vector<8x8xf32>
    %cst_40 = arith.constant dense<0.000000e+00> : vector<32x8xf32>
    %117 = tpu.matmul %115, %116, %cst_40 {dimension_numbers = #tpu.dot_dimension_numbers<[1], [1], [0], [0], [0, 0, 1, 0], [], []>} : vector<32x8xf32>, vector<8x8xf32>, vector<32x8xf32> -> vector<32x8xf32>
    %cst_41 = arith.constant dense<0xFF800000> : vector<32xf32>
    %118 = vector.multi_reduction <maximumf>, %117, %cst_41 [1] : vector<32x8xf32> to vector<32xf32>
    %119 = vector.shape_cast %118 : vector<32xf32> to vector<32x1xf32>
    %120 = vector.broadcast %119 : vector<32x1xf32> to vector<32x8xf32>
    %121 = arith.subf %117, %120 : vector<32x8xf32>
    %122 = math.exp %121 : vector<32x8xf32>
    %cst_42 = arith.constant dense<0.000000e+00> : vector<32xf32>
    %123 = vector.multi_reduction <add>, %122, %cst_42 [1] : vector<32x8xf32> to vector<32xf32>
    %124 = vector.shape_cast %123 : vector<32xf32> to vector<32x1xf32>
    %125 = tpu.reciprocal %124 {approx = true} : vector<32x1xf32> -> vector<32x1xf32>
    %126 = vector.broadcast %125 : vector<32x1xf32> to vector<32x8xf32>
    %127 = arith.mulf %122, %126 : vector<32x8xf32>
    %128 = vector.extract_strided_slice %82 {offsets = [0, 16], sizes = [8, 8], strides = [1, 1]} : vector<8x32xf32> to vector<8x8xf32>
    %cst_43 = arith.constant dense<0.000000e+00> : vector<32x8xf32>
    %129 = tpu.matmul %127, %128, %cst_43 {dimension_numbers = #tpu.dot_dimension_numbers<[1], [0], [0], [1], [0, 0, 1, 1], [], []>} : vector<32x8xf32>, vector<8x8xf32>, vector<32x8xf32> -> vector<32x8xf32>
    %c32_44 = arith.constant 32 : index
    %c16_45 = arith.constant 16 : index
    %130 = vector.load %arg5[%c32_44, %c16_45] : memref<64x32xf32, #tpu.memory_space<vmem>>, vector<32x8xf32>
    tpu.vector_store %arg5[%c32_44, %c16_45], %129 {strides = array<i32>} : memref<64x32xf32, #tpu.memory_space<vmem>>, vector<32x8xf32>,
    %131 = vector.extract_strided_slice %80 {offsets = [0, 24], sizes = [32, 8], strides = [1, 1]} : vector<32x32xf32> to vector<32x8xf32>
    %132 = vector.extract_strided_slice %81 {offsets = [0, 24], sizes = [8, 8], strides = [1, 1]} : vector<8x32xf32> to vector<8x8xf32>
    %cst_46 = arith.constant dense<0.000000e+00> : vector<32x8xf32>
    %133 = tpu.matmul %131, %132, %cst_46 {dimension_numbers = #tpu.dot_dimension_numbers<[1], [1], [0], [0], [0, 0, 1, 0], [], []>} : vector<32x8xf32>, vector<8x8xf32>, vector<32x8xf32> -> vector<32x8xf32>
    %cst_47 = arith.constant dense<0xFF800000> : vector<32xf32>
    %134 = vector.multi_reduction <maximumf>, %133, %cst_47 [1] : vector<32x8xf32> to vector<32xf32>
    %135 = vector.shape_cast %134 : vector<32xf32> to vector<32x1xf32>
    %136 = vector.broadcast %135 : vector<32x1xf32> to vector<32x8xf32>
    %137 = arith.subf %133, %136 : vector<32x8xf32>
    %138 = math.exp %137 : vector<32x8xf32>
    %cst_48 = arith.constant dense<0.000000e+00> : vector<32xf32>
    %139 = vector.multi_reduction <add>, %138, %cst_48 [1] : vector<32x8xf32> to vector<32xf32>
    %140 = vector.shape_cast %139 : vector<32xf32> to vector<32x1xf32>
    %141 = tpu.reciprocal %140 {approx = true} : vector<32x1xf32> -> vector<32x1xf32>
    %142 = vector.broadcast %141 : vector<32x1xf32> to vector<32x8xf32>
    %143 = arith.mulf %138, %142 : vector<32x8xf32>
    %144 = vector.extract_strided_slice %82 {offsets = [0, 24], sizes = [8, 8], strides = [1, 1]} : vector<8x32xf32> to vector<8x8xf32>
    %cst_49 = arith.constant dense<0.000000e+00> : vector<32x8xf32>
    %145 = tpu.matmul %143, %144, %cst_49 {dimension_numbers = #tpu.dot_dimension_numbers<[1], [0], [0], [1], [0, 0, 1, 1], [], []>} : vector<32x8xf32>, vector<8x8xf32>, vector<32x8xf32> -> vector<32x8xf32>
    %c32_50 = arith.constant 32 : index
    %c24_51 = arith.constant 24 : index
    %146 = vector.load %arg5[%c32_50, %c24_51] : memref<64x32xf32, #tpu.memory_space<vmem>>, vector<32x8xf32>
    tpu.vector_store %arg5[%c32_50, %c24_51], %145 {strides = array<i32>} : memref<64x32xf32, #tpu.memory_space<vmem>>, vector<32x8xf32>,
    return
  }
  func.func @transform_0(%arg0: i32) -> (i32, i32) {
    %c0_i32 = arith.constant 0 : i32
    %c0_i32_0 = arith.constant 0 : i32
    return %arg0, %c0_i32 : i32, i32
  }
  func.func @transform_1(%arg0: i32) -> (i32, i32) {
    %c0_i32 = arith.constant 0 : i32
    %c0_i32_0 = arith.constant 0 : i32
    %c0_i32_1 = arith.constant 0 : i32
    return %c0_i32, %c0_i32_0 : i32, i32
  }
  func.func @transform_2(%arg0: i32) -> (i32, i32) {
    %c0_i32 = arith.constant 0 : i32
    %c0_i32_0 = arith.constant 0 : i32
    %c0_i32_1 = arith.constant 0 : i32
    return %c0_i32, %c0_i32_0 : i32, i32
  }
  func.func @transform_3(%arg0: i32) -> (i32, i32) {
    %c0_i32 = arith.constant 0 : i32
    %c0_i32_0 = arith.constant 0 : i32
    return %arg0, %c0_i32 : i32, i32
  }
  func.func @transform_4(%arg0: i32) -> (i32, i32) {
    %c0_i32 = arith.constant 0 : i32
    %c0_i32_0 = arith.constant 0 : i32
    return %arg0, %c0_i32 : i32, i32
  }
}

</mosaic_0001>

<bundles_post_ra>
// kernel: tpu_custom_call.1
= control target key start
LH: loop header
LB: loop body
LE: loop exit
PB: predicated region body
PF: predicated region fallthrough
CT: control target
= control target key end

     0   :  { %vm36_vm0 = vcmask 261120   ;;  %v2990_v3 = vmov 0   ;;  %vm383_vm1 = vcmask 64512   ;;  %vm246_vm2 = vcmask 781568   ;;  %s2991_s21 = smov 96   ;;  %s2993_s29 = smov 120   ;;  %s3806_s1 = inlined_call_operand.vmem [shape: f32[32,96], index: 1, kind: input, shape index: {}]   ;;  %s3807_s0 = inlined_call_operand.vmem [shape: f32[64,32], index: 0, kind: input, shape index: {}]   ;;  %s3808_s3 = inlined_call_operand.vmem [shape: f32[64,1], index: 3, kind: input, shape index: {}]   ;;  %s3809_s2 = inlined_call_operand.vmem [shape: f32[1,96], index: 2, kind: input, shape index: {}]   ;;  %s3810_s4 = inlined_call_operand.vmem [shape: f32[64,32], index: 4, kind: output, shape index: {}]  }
   0x1   :  { %v25_v0 = vld [vmem:[%s3806_s1] sm:$0xff]  ;;  %v26_v1 = vld [vmem:[%s3806_s1 + $0x8] sm:$0xff]  ;;  %v27_v2 = vld [vmem:[%s3806_s1 + $0x10] sm:$0xff]  ;;  %2860 = vset.pattern.permute.xlu0 %v2990_v3  ;;  %2861 = vset.pattern.permute.xlu1 %v2990_v3  ;;  %vm367_vm3 = vcmask 1041409   ;;  %vm369_vm4 = vcmask 1042434   ;;  %vm371_vm5 = vcmask 1043459  }
   0x2   :  { %v2837_v4 = vpack.c.bf16 %v26_v1, %v25_v0  ;;  %v28_v5 = vld [vmem:[%s3806_s1 + $0x18] sm:$0xff]  ;;  %v17_v6 = vld [vmem:[%s3807_s0] sm:$0xff]  ;;  %v168_v9 = vld [vmem:[%s3808_s3 + $0x10] sm:$0xff]  ;;  %vm373_vm6 = vcmask 1044484   ;;  %vm375_vm7 = vcmask 1045509   ;;  %vm377_vm8 = vcmask 1046534  }
   0x3   :  { %v2841_v7 = vpack.c.bf16 %v28_v5, %v27_v2  ;;  %2697 = vmatprep.mubr.msk.f32.mxu0 %vm36_vm0, %v17_v6  ;;  %v166_v8 = vld [vmem:[%s3808_s3] sm:$0xff]  ;;  %186 = vperm.xlu1 %2861, %v168_v9   ;;  %v167_v10 = vld [vmem:[%s3808_s3 + $0x8] sm:$0xff]  ;;  %v169_v11 = vld [vmem:[%s3808_s3 + $0x18] sm:$0xff]  ;;  %vm379_vm9 = vcmask 1047559   ;;  %s2992_s1 = smov 88   ;;  %s2994_s30 = smov 64  }
   0x4   :  { %2838 = vmatprep.subr.bf16.mxu0 %v2837_v4  ;;  %176 = vperm.xlu0 %2860, %v166_v8   ;;  %v18_v12 = vld [vmem:[%s3807_s0 + $0x8] sm:$0xff]  ;;  %v19_v13 = vld [vmem:[%s3807_s0 + $0x10] sm:$0xff]  ;;  %v20_v14 = vld [vmem:[%s3807_s0 + $0x18] sm:$0xff]  ;;  %s2996_s5 = smov 112   ;;  %s2997_s6 = smov 104   ;;  %vm896_vm10 = vcmask 130112  }
   0x5   :  { %2840 = vmatpush3.bf16.msra.mxu0 %v2837_v4  ;;  %v3073_v16 = vld [vmem:[%s3809_s2] ss:$0 sm:$0xff]  ;;  %s2998_s7 = smov 72   ;;  %s2999_s8 = smov 48   ;;  %vm1166_vm11 = vcmask 195712   ;;  %vm1436_vm12 = vcmask 261312  }
   0x6   :  { %2842 = vmatprep.subr.bf16.mxu0 %v2841_v7  ;;  %s3000_s9 = smov 56   ;;  %s3001_s10 = smov 40  }
   0x7   :  { %191 = vperm.xlu1 %2861, %v169_v11   ;;  %s3002_s18 = smov 8   ;;  %s3003_s19 = smov 16  }
   0x8   :  { %181 = vperm.xlu0 %2860, %v167_v10   ;;  %s3004_s20 = smov 24  }
   0x9   :  { %2844 = vmatpush3.bf16.msra.mxu0 %v2841_v7 }
   0xc   :  { %2698 = vmatmul.mubr.msk.f32.vlgmr.msra.gmra.mrb[0].mxu0 %vm36_vm0, %v18_v12 }
   0xd   :  { %2700 = vmatprep.mubr.msk.f32.mxu0 %vm36_vm0, %v19_v13 }
  0x10   :  { %2701 = vmatmul.mubr.msk.f32.gmra.mrb[2].mxu0 %vm36_vm0, %v20_v14 }
  0x82   :  { %v187_v17 = vpop.permute.xlu1 %186 }
  0x83   :  { %v177_v15 = vpop.permute.xlu0 %176 }
  0x86   :  { %v192_v26 = vpop.permute.xlu1 %191 }
  0x87   :  { %v182_v19 = vpop.permute.xlu0 %181 }
  0xdf   :  { %v2699_v18 = vpop.f32.mrb[0].mxu0 }
  0xe0   :  { %v3076_v20 = vadd.f32 %v2699_v18, %v3073_v16  ;;  %v127_v21 = vpop.f32.mrb[1].mxu0 }
  0xe1   :  { %v3079_v22 = vadd.f32 %v3073_v16, %v127_v21 }
  0xe2   :  { %v215_v23 = vadd.f32 %v182_v19, %v3076_v20 }
  0xe3   :  { %v214_v24 = vadd.f32 %v177_v15, %v3079_v22  ;;  %v2702_v25 = vpop.f32.mrb[2].mxu0  ;;  %2711 = vmatprep.mubr.msk.f32.mxu1 %vm383_vm1, %v3079_v22 }
  0xe4   :  { %v231_v27 = vcombine.high %v215_v23, %v215_v23  ;;  %v261_v28 = vsel %vm246_vm2, %v215_v23, -inf  ;;  %v3087_v29 = vadd.f32 %v2702_v25, %v3073_v16  ;;  %v137_v30 = vpop.f32.mrb[3].mxu0 }
  0xe5   :  { %v262_v31 = vrot.slane %v261_v28, 4  ;;  %v230_v32 = vcombine.high %v214_v24, %v214_v24  ;;  %v247_v33 = vsel %vm246_vm2, %v214_v24, -inf  ;;  %v3091_v34 = vadd.f32 %v3073_v16, %v137_v30 }
  0xe6   :  { %v268_v35 = vsel %vm246_vm2, %v231_v27, -inf  ;;  %v248_v36 = vrot.slane %v247_v33, 4  ;;  %v217_v37 = vadd.f32 %v192_v26, %v3087_v29 }
  0xe7   :  { %v263_v38 = vmax.f32 %v261_v28, %v262_v31  ;;  %v269_v39 = vrot.slane %v268_v35, 4  ;;  %v254_v40 = vsel %vm246_vm2, %v230_v32, -inf  ;;  %v216_v41 = vadd.f32 %v187_v17, %v3091_v34 }
  0xe8   :  { %v249_v42 = vmax.f32 %v247_v33, %v248_v36  ;;  %v255_v43 = vrot.slane %v254_v40, 4  ;;  %v233_v44 = vcombine.high %v217_v37, %v217_v37  ;;  %v289_v45 = vsel %vm246_vm2, %v217_v37, -inf  ;;  %v22_v36 = vld [vmem:[%s3807_s0 + $0x28] sm:$0xff]  ;;  %v23_v37 = vld [vmem:[%s3807_s0 + $0x30] sm:$0xff] }
  0xe9   :  { %v264_v46 = vrot.slane %v263_v38, 2  ;;  %v270_v47 = vmax.f32 %v268_v35, %v269_v39  ;;  %v290_v48 = vrot.slane %v289_v45, 4  ;;  %v232_v49 = vcombine.high %v216_v41, %v216_v41  ;;  %v21_v35 = vld [vmem:[%s3807_s0 + $0x20] sm:$0xff] }
  0xea   :  { %v250_v50 = vrot.slane %v249_v42, 2  ;;  %v256_v51 = vmax.f32 %v254_v40, %v255_v43  ;;  %v296_v52 = vsel %vm246_vm2, %v233_v44, -inf  ;;  %v275_v53 = vsel %vm246_vm2, %v216_v41, -inf  ;;  %2703 = vmatprep.mubr.msk.f32.mxu0 %vm36_vm0, %v21_v35 }
  0xeb   :  { %v265_v54 = vmax.f32 %v263_v38, %v264_v46  ;;  %v271_v55 = vrot.slane %v270_v47, 2  ;;  %v291_v56 = vmax.f32 %v289_v45, %v290_v48  ;;  %v297_v57 = vrot.slane %v296_v52, 4  ;;  %2704 = vmatmul.mubr.msk.f32.gmra.mrb[4].mxu0 %vm36_vm0, %v22_v36 }
  0xec   :  { %v251_v58 = vmax.f32 %v249_v42, %v250_v50  ;;  %v257_v59 = vrot.slane %v256_v51, 2  ;;  %v276_v60 = vrot.slane %v275_v53, 4  ;;  %v282_v61 = vsel %vm246_vm2, %v232_v49, -inf  ;;  %2706 = vmatprep.mubr.msk.f32.mxu0 %vm36_vm0, %v23_v37  ;;  %v24_v42 = vld [vmem:[%s3807_s0 + $0x38] sm:$0xff] }
  0xed   :  { %v272_v62 = vmax.f32 %v270_v47, %v271_v55  ;;  %v292_v63 = vrot.slane %v291_v56, 2  ;;  %v298_v0 = vmax.f32 %v296_v52, %v297_v57  ;;  %v283_v4 = vrot.slane %v282_v61, 4  ;;  %v172_v55 = vld [vmem:[%s3808_s3 + $0x30] sm:$0xff]  ;;  %v170_v57 = vld [vmem:[%s3808_s3 + $0x20] sm:$0xff] }
  0xee   :  { %v252_v1 = vrot.slane %v251_v58, 1  ;;  %v258_v2 = vmax.f32 %v256_v51, %v257_v59  ;;  %v277_v3 = vmax.f32 %v275_v53, %v276_v60  ;;  %v266_v5 = vrot.slane %v265_v54, 1  ;;  %v171_v53 = vld [vmem:[%s3808_s3 + $0x28] sm:$0xff]  ;;  %v173_v60 = vld [vmem:[%s3808_s3 + $0x38] sm:$0xff]  ;;  %s2995_s3 = smov 80  }
  0xef   :  { %v299_v6 = vrot.slane %v298_v0, 2  ;;  %v273_v7 = vrot.slane %v272_v62, 1  ;;  %v284_v10 = vmax.f32 %v282_v61, %v283_v4  ;;  %v293_v12 = vmax.f32 %v291_v56, %v292_v63  ;;  %2707 = vmatmul.mubr.msk.f32.gmra.mrb[6].mxu0 %vm36_vm0, %v24_v42 }
  0xf0   :  { %v259_v8 = vrot.slane %v258_v2, 1  ;;  %v278_v9 = vrot.slane %v277_v3, 2  ;;  %v253_v11 = vmax.f32 %v251_v58, %v252_v1  ;;  %v267_v18 = vmax.f32 %v265_v54, %v266_v5 }
  0xf1   :  { %v300_v14 = vmax.f32 %v298_v0, %v299_v6  ;;  %v285_v17 = vrot.slane %v284_v10, 2  ;;  %v274_v19 = vmax.f32 %v272_v62, %v273_v7  ;;  %v294_v25 = vrot.slane %v293_v12, 1 }
  0xf2   :  { %v260_v13 = vmax.f32 %v258_v2, %v259_v8  ;;  %v279_v15 = vmax.f32 %v277_v3, %v278_v9 }
  0xf3   :  { %v286_v24 = vmax.f32 %v284_v10, %v285_v17  ;;  %v301_v27 = vrot.slane %v300_v14, 1  ;;  %v295_v38 = vmax.f32 %v293_v12, %v294_v25 }
  0xf4   :  { %v368_v21 = vsel %vm367_vm3, %v260_v13, %v253_v11  ;;  %v280_v23 = vrot.slane %v279_v15, 1 }
  0xf5   :  { %v370_v26 = vsel %vm369_vm4, %v267_v18, %v368_v21  ;;  %v287_v30 = vrot.slane %v286_v24, 1  ;;  %v302_v39 = vmax.f32 %v300_v14, %v301_v27 }
  0xf6   :  { %v281_v28 = vmax.f32 %v279_v15, %v280_v23  ;;  %v372_v31 = vsel %vm371_vm5, %v274_v19, %v370_v26 }
  0xf7   :  { %v288_v32 = vmax.f32 %v286_v24, %v287_v30 }
  0xf8   :  { %v374_v33 = vsel %vm373_vm6, %v281_v28, %v372_v31 }
  0xf9   :  { %v376_v40 = vsel %vm375_vm7, %v288_v32, %v374_v33 }
  0xfa   :  { %v378_v41 = vsel %vm377_vm8, %v295_v38, %v376_v40 }
  0xfb   :  { %v3123_v43 = vsel %vm379_vm9, %v302_v39, %v378_v41 }
  0xfc   :  { %381 = vrot.lane.b32.xlu0 %v3123_v43, %s2991_s21 }
 0x16e   :  { %v382_v44 = vpop.permute.xlu0 %381 }
 0x16f   :  { %2709 = vmatprep.subr.msk.mxu1 %vm383_vm1, %v382_v44 }
 0x170   :  { %2710 = vmatpush3.xpose.msk.msra.mxu1 %vm383_vm1, %v382_v44 }
 0x173   :  { %2712 = vmatmul.mubr.msk.f32.vlgmr.msra.gmra.mrb[0].mxu1 %vm383_vm1, %v3076_v20 }
 0x174   :  { %2714 = vmatprep.mubr.msk.f32.mxu1 %vm383_vm1, %v3091_v34 }
 0x177   :  { %2715 = vmatmul.mubr.msk.f32.gmra.mrb[2].mxu1 %vm383_vm1, %v3087_v29 }
 0x1be   :  { %v2705_v54 = vpop.f32.mrb[4].mxu0 }
 0x1bf   :  { %v147_v56 = vpop.f32.mrb[5].mxu0  ;;  %v3169_v18 = vadd.f32 %v2705_v54, %v3073_v16 }
 0x1c0   :  { %v3161_v10 = vadd.f32 %v3073_v16, %v147_v56 }
 0x1c2   :  { %v3149_v58 = vpop.f32.mrb[6].mxu0 }
 0x1c3   :  { %v157_v59 = vpop.f32.mrb[7].mxu0 }
 0x1c4   :  { %v3186_v31 = vadd.f32 %v3073_v16, %v157_v59 }
 0x246   :  { %v2713_v45 = vpop.f32.mrb[0].mxu1 }
 0x247   :  { %v464_v46 = vpop.f32.mrb[1].mxu1  ;;  %v486_v47 = vsel %vm383_vm1, %v2713_v45, -inf }
 0x248   :  { %487 = vmax.xlane.f32.xlu0 %v486_v47  ;;  %v483_v48 = vsel %vm383_vm1, %v464_v46, -inf }
 0x249   :  { %484 = vmax.xlane.f32.xlu1 %v483_v48 }
 0x24a   :  { %v2716_v49 = vpop.f32.mrb[2].mxu1 }
 0x24b   :  { %v474_v50 = vpop.f32.mrb[3].mxu1  ;;  %v492_v51 = vsel %vm383_vm1, %v2716_v49, -inf }
 0x24c   :  { %v489_v52 = vsel %vm383_vm1, %v474_v50, -inf }
 0x24d   :  { %493 = vmax.xlane.f32.xlu1 %v492_v51  ;;  %490 = vmax.xlane.f32.xlu0 %v489_v52 }
 0x25e   :  { %201 = vperm.xlu1 %2861, %v171_v53  }
 0x262   :  { %206 = vperm.xlu1 %2861, %v172_v55  }
 0x263   :  { %196 = vperm.xlu0 %2860, %v170_v57  }
 0x266   :  { %639 = vrot.lane.b32.xlu1 %v3123_v43, %s2992_s1 }
 0x267   :  { %211 = vperm.xlu0 %2860, %v173_v60  }
 0x26a   :  { %631 = vrot.lane.b32.xlu1 %v3079_v22, %s2993_s29 }
 0x26b   :  { %527 = vrot.lane.b32.xlu0 %v3123_v43, %s2994_s30 }
 0x2d5   :  { %v488_v61 = vpop.xlane.xlu0 %487 }
 0x2d6   :  { %v496_v62 = vsub.f32 %v2713_v45, %v488_v61  ;;  %v485_v63 = vpop.xlane.xlu1 %484  ;;  %v3198_v45 = vadd.f32 %v3149_v58, %v3073_v16 }
 0x2d7   :  { %v495_v1 = vsub.f32 %v464_v46, %v485_v63 }
 0x2d8   :  { %v501_v0 = vmul.f32 1.442695, %v496_v62 }
 0x2d9   :  { %v499_v6 = vmul.f32 1.442695, %v495_v1 }
 0x2da   :  { %2862 = vpow2.f32 %v501_v0  ;;  %v494_v2 = vpop.xlane.xlu1 %493  ;;  %v491_v3 = vpop.xlane.xlu0 %490 }
 0x2db   :  { %v498_v4 = vsub.f32 %v2716_v49, %v494_v2  ;;  %v497_v5 = vsub.f32 %v474_v50, %v491_v3  ;;  %2864 = vpow2.f32 %v499_v6 }
 0x2dd   :  { %v505_v7 = vmul.f32 1.442695, %v498_v4  ;;  %v503_v8 = vmul.f32 1.442695, %v497_v5 }
 0x2de   :  { %v202_v9 = vpop.permute.xlu1 %201 }
 0x2df   :  { %2866 = vpow2.f32 %v505_v7  ;;  %v219_v27 = vadd.f32 %v202_v9, %v3169_v18 }
 0x2e0   :  { %2868 = vpow2.f32 %v503_v8 }
 0x2e1   :  { %v235_v37 = vcombine.high %v219_v27, %v219_v27  ;;  %v317_v38 = vsel %vm246_vm2, %v219_v27, -inf }
 0x2e2   :  { %v197_v11 = vpop.permute.xlu0 %196  ;;  %v207_v13 = vpop.permute.xlu1 %206  ;;  %v318_v42 = vrot.slane %v317_v38, 4 }
 0x2e3   :  { %v218_v14 = vadd.f32 %v197_v11, %v3161_v10  ;;  %v220_v40 = vadd.f32 %v207_v13, %v3186_v31  ;;  %v324_v44 = vsel %vm246_vm2, %v235_v37, -inf }
 0x2e4   :  { %v3163_v12 = vpop.eup %2862  ;;  %v325_v48 = vrot.slane %v324_v44, 4  ;;  %v319_v51 = vmax.f32 %v317_v38, %v318_v42 }
 0x2e5   :  { %v510_v17 = vsel %vm383_vm1, %v3163_v12, 0.0  ;;  %v234_v19 = vcombine.high %v218_v14, %v218_v14  ;;  %v3171_v23 = vpop.eup %2864  ;;  %v303_v32 = vsel %vm246_vm2, %v218_v14, -inf  ;;  %v236_v47 = vcombine.high %v220_v40, %v220_v40 }
 0x2e6   :  { %v212_v15 = vpop.permute.xlu0 %211  ;;  %511 = vadd.xlane.f32.xlu0 %v510_v17  ;;  %v3175_v25 = vpop.permute.xlu1 %639  ;;  %v507_v30 = vsel %vm383_vm1, %v3171_v23, 0.0  ;;  %v304_v39 = vrot.slane %v303_v32, 4  ;;  %v331_v49 = vsel %vm246_vm2, %v220_v40, -inf  ;;  %v326_v56 = vmax.f32 %v324_v44, %v325_v48 }
 0x2e7   :  { %v310_v28 = vsel %vm246_vm2, %v234_v19, -inf  ;;  %508 = vadd.xlane.f32.xlu1 %v507_v30  ;;  %v221_v52 = vadd.f32 %v212_v15, %v3198_v45  ;;  %v332_v54 = vrot.slane %v331_v49, 4  ;;  %v338_v55 = vsel %vm246_vm2, %v236_v47, -inf }
 0x2e8   :  { %v311_v36 = vrot.slane %v310_v28, 4  ;;  %v305_v46 = vmax.f32 %v303_v32, %v304_v39  ;;  %v320_v59 = vrot.slane %v319_v51, 2  ;;  %v339_v61 = vrot.slane %v338_v55, 4 }
 0x2e9   :  { %v3173_v24 = vpop.eup %2866  ;;  %v237_v60 = vcombine.high %v221_v52, %v221_v52  ;;  %v345_v58 = vsel %vm246_vm2, %v221_v52, -inf  ;;  %v333_v62 = vmax.f32 %v331_v49, %v332_v54  ;;  %v327_v63 = vrot.slane %v326_v56, 2 }
 0x2ea   :  { %v528_v21 = vpop.permute.xlu0 %527  ;;  %v3177_v26 = vpop.eup %2868  ;;  %v516_v33 = vsel %vm383_vm1, %v3173_v24, 0.0  ;;  %v312_v41 = vmax.f32 %v310_v28, %v311_v36  ;;  %v306_v53 = vrot.slane %v305_v46, 2  ;;  %v321_v1 = vmax.f32 %v319_v51, %v320_v59 }
 0x2eb   :  { %2717 = vmatprep.subr.mxu1 %v528_v21  ;;  %v513_v35 = vsel %vm383_vm1, %v3177_v26, 0.0  ;;  %517 = vadd.xlane.f32.xlu1 %v516_v33  ;;  %v346_v2 = vrot.slane %v345_v58, 4  ;;  %v352_v3 = vsel %vm246_vm2, %v237_v60, -inf  ;;  %v340_v4 = vmax.f32 %v338_v55, %v339_v61 }
 0x2ec   :  { %2718 = vmatpush3.msra.mxu1 %v528_v21  ;;  %514 = vadd.xlane.f32.xlu0 %v513_v35  ;;  %v313_v50 = vrot.slane %v312_v41, 2  ;;  %v307_v16 = vmax.f32 %v305_v46, %v306_v53  ;;  %v334_v6 = vrot.slane %v333_v62, 2  ;;  %v328_v7 = vmax.f32 %v326_v56, %v327_v63 }
 0x2ed   :  { %2725 = vmatprep.subr.msk.mxu1 %vm383_vm1, %v3175_v25  ;;  %v353_v9 = vrot.slane %v352_v3, 4  ;;  %v322_v11 = vrot.slane %v321_v1, 1  ;;  %v347_v13 = vmax.f32 %v345_v58, %v346_v2  ;;  %v341_v14 = vrot.slane %v340_v4, 2 }
 0x2ee   :  { %v314_v57 = vmax.f32 %v312_v41, %v313_v50  ;;  %v308_v5 = vrot.slane %v307_v16, 1  ;;  %v335_v17 = vmax.f32 %v333_v62, %v334_v6  ;;  %v329_v19 = vrot.slane %v328_v7, 1 }
 0x2ef   :  { %v354_v27 = vmax.f32 %v352_v3, %v353_v9  ;;  %v323_v28 = vmax.f32 %v321_v1, %v322_v11  ;;  %v348_v30 = vrot.slane %v347_v13, 2  ;;  %v342_v32 = vmax.f32 %v340_v4, %v341_v14 }
 0x2f0   :  { %v315_v0 = vrot.slane %v314_v57, 1  ;;  %v309_v15 = vmax.f32 %v307_v16, %v308_v5  ;;  %v336_v33 = vrot.slane %v335_v17, 1  ;;  %v330_v36 = vmax.f32 %v328_v7, %v329_v19 }
 0x2f1   :  { %v355_v37 = vrot.slane %v354_v27, 2  ;;  %v349_v38 = vmax.f32 %v347_v13, %v348_v30  ;;  %v343_v39 = vrot.slane %v342_v32, 1 }
 0x2f2   :  { %v316_v8 = vmax.f32 %v314_v57, %v315_v0  ;;  %v337_v41 = vmax.f32 %v335_v17, %v336_v33 }
 0x2f3   :  { %v356_v42 = vmax.f32 %v354_v27, %v355_v37  ;;  %v350_v46 = vrot.slane %v349_v38, 1  ;;  %v344_v47 = vmax.f32 %v342_v32, %v343_v39 }
 0x2f4   :  { %v1449_v21 = vsel %vm367_vm3, %v316_v8, %v309_v15 }
 0x2f5   :  { %v1450_v35 = vsel %vm369_vm4, %v323_v28, %v1449_v21  ;;  %v357_v49 = vrot.slane %v356_v42, 1  ;;  %v351_v50 = vmax.f32 %v349_v38, %v350_v46 }
 0x2f6   :  { %v1451_v40 = vsel %vm371_vm5, %v330_v36, %v1450_v35 }
 0x2f7   :  { %v1452_v44 = vsel %vm373_vm6, %v337_v41, %v1451_v40  ;;  %v358_v52 = vmax.f32 %v356_v42, %v357_v49 }
 0x2f8   :  { %v1453_v48 = vsel %vm375_vm7, %v344_v47, %v1452_v44 }
 0x2f9   :  { %v1454_v51 = vsel %vm377_vm8, %v351_v50, %v1453_v48 }
 0x2fa   :  { %v3233_v53 = vsel %vm379_vm9, %v358_v52, %v1454_v51 }
 0x2fc   :  { %635 = vrot.lane.b32.xlu1 %v3091_v34, %s2993_s29 }
 0x300   :  { %909 = vrot.lane.b32.xlu1 %v3123_v43, %s2995_s3 }
 0x302   :  { %633 = vrot.lane.b32.xlu0 %v3076_v20, %s2993_s29 }
 0x304   :  { %903 = vrot.lane.b32.xlu1 %v3076_v20, %s2996_s5 }
 0x306   :  { %637 = vrot.lane.b32.xlu0 %v3087_v29, %s2993_s29 }
 0x308   :  { %907 = vrot.lane.b32.xlu1 %v3087_v29, %s2996_s5 }
 0x30a   :  { %901 = vrot.lane.b32.xlu0 %v3079_v22, %s2996_s5 }
 0x30c   :  { %1171 = vrot.lane.b32.xlu1 %v3079_v22, %s2997_s6 }
 0x30e   :  { %905 = vrot.lane.b32.xlu0 %v3091_v34, %s2996_s5 }
 0x310   :  { %1175 = vrot.lane.b32.xlu1 %v3091_v34, %s2997_s6 }
 0x312   :  { %1179 = vrot.lane.b32.xlu0 %v3123_v43, %s2998_s7 }
 0x314   :  { %1456 = vrot.lane.b32.xlu1 %v3233_v53, %s2991_s21 }
 0x316   :  { %1173 = vrot.lane.b32.xlu0 %v3076_v20, %s2997_s6  ;;  %v632_v20 = vpop.permute.xlu1 %631 }
 0x318   :  { %1705 = vrot.lane.b32.xlu1 %v3161_v10, %s2993_s29 }
 0x31a   :  { %1177 = vrot.lane.b32.xlu0 %v3087_v29, %s2997_s6 }
 0x31c   :  { %1709 = vrot.lane.b32.xlu1 %v3186_v31, %s2993_s29 }
 0x31e   :  { %1713 = vrot.lane.b32.xlu0 %v3233_v53, %s2992_s1 }
 0x320   :  { %1982 = vrot.lane.b32.xlu1 %v3233_v53, %s2995_s3 }
 0x322   :  { %1707 = vrot.lane.b32.xlu0 %v3169_v18, %s2993_s29 }
 0x324   :  { %1976 = vrot.lane.b32.xlu1 %v3169_v18, %s2996_s5 }
 0x326   :  { %1711 = vrot.lane.b32.xlu0 %v3198_v45, %s2993_s29 }
 0x328   :  { %1980 = vrot.lane.b32.xlu1 %v3198_v45, %s2996_s5 }
 0x32a   :  { %1974 = vrot.lane.b32.xlu0 %v3161_v10, %s2996_s5 }
 0x32c   :  { %2243 = vrot.lane.b32.xlu1 %v3161_v10, %s2997_s6 }
 0x32e   :  { %1978 = vrot.lane.b32.xlu0 %v3186_v31, %s2996_s5 }
 0x330   :  { %2247 = vrot.lane.b32.xlu1 %v3186_v31, %s2997_s6 }
 0x332   :  { %2251 = vrot.lane.b32.xlu0 %v3233_v53, %s2998_s7 }
 0x334   :  { %1050 = vrot.lane.b32.xlu1 %v3123_v43, %s2999_s8 }
 0x336   :  { %2245 = vrot.lane.b32.xlu0 %v3169_v18, %s2997_s6 }
 0x33a   :  { %2249 = vrot.lane.b32.xlu0 %v3198_v45, %s2997_s6 }
 0x33e   :  { %780 = vrot.lane.b32.xlu0 %v3123_v43, %s3000_s9 }
 0x342   :  { %1320 = vrot.lane.b32.xlu0 %v3123_v43, %s3001_s10 }
 0x373   :  { %v512_v22 = vpop.xlane.xlu0 %511 }
 0x374   :  { %2870 = vrcp.f32 %v512_v22  ;;  %v509_v29 = vpop.xlane.xlu1 %508 }
 0x375   :  { %2872 = vrcp.f32 %v509_v29 }
 0x378   :  { %v518_v54 = vpop.xlane.xlu1 %517 }
 0x379   :  { %v515_v34 = vpop.xlane.xlu0 %514 }
 0x37a   :  { %2874 = vrcp.f32 %v515_v34 }
 0x37b   :  { %2876 = vrcp.f32 %v518_v54 }
 0x37c   :  { %v636_v56 = vpop.permute.xlu1 %635 }
 0x37d   :  { %v634_v55 = vpop.permute.xlu0 %633 }
 0x37e   :  { %v2871_v57 = vpop.eup %2870 }
 0x37f   :  { %v2873_v60 = vpop.eup %2872  ;;  %v524_v43 = vmul.f32 %v2871_v57, %v3163_v12 }
 0x380   :  { %v910_v61 = vpop.permute.xlu1 %909  ;;  %v523_v16 = vmul.f32 %v2873_v60, %v3171_v23 }
 0x381   :  { %v638_v59 = vpop.permute.xlu0 %637 }
 0x382   :  { %2719 = vmatprep.mubr.msk.f32.mxu1 %vm383_vm1, %v523_v16 }
 0x383   :  { %2720 = vmatmul.mubr.msk.f32.vlgmr.msra.gmra.mrb[4].mxu1 %vm383_vm1, %v524_v43 }
 0x384   :  { %v2875_v58 = vpop.eup %2874  ;;  %2726 = vmatpush3.xpose.msk.msra.mxu1 %vm383_vm1, %v3175_v25  ;;  %v904_v1 = vpop.permute.xlu1 %903 }
 0x385   :  { %v902_v62 = vpop.permute.xlu0 %901  ;;  %v525_v63 = vmul.f32 %v2875_v58, %v3177_v26  ;;  %v2877_v0 = vpop.eup %2876  ;;  %2741 = vmatprep.subr.msk.mxu1 %vm383_vm1, %v910_v61 }
 0x386   :  { %v526_v2 = vmul.f32 %v2877_v0, %v3173_v24 }
 0x387   :  { %2722 = vmatprep.mubr.msk.f32.mxu1 %vm383_vm1, %v525_v63 }
 0x388   :  { %2723 = vmatmul.mubr.msk.f32.gmra.mrb[6].mxu1 %vm383_vm1, %v526_v2  ;;  %v908_v12 = vpop.permute.xlu1 %907 }
 0x389   :  { %v906_v23 = vpop.permute.xlu0 %905  ;;  %2727 = vmatprep.mubr.msk.f32.mxu1 %vm383_vm1, %v632_v20 }
 0x38c   :  { %2728 = vmatmul.mubr.msk.f32.vlgmr.msra.gmra.mrb[8].mxu1 %vm383_vm1, %v634_v55  ;;  %v1172_v3 = vpop.permute.xlu1 %1171 }
 0x38d   :  { %v1180_v26 = vpop.permute.xlu0 %1179  ;;  %2742 = vmatpush3.xpose.msk.msra.mxu1 %vm383_vm1, %v910_v61  ;;  %2730 = vmatprep.mubr.msk.f32.mxu1 %vm383_vm1, %v636_v56 }
 0x38e   :  { %2757 = vmatprep.subr.msk.mxu1 %vm383_vm1, %v1180_v26 }
 0x390   :  { %2731 = vmatmul.mubr.msk.f32.gmra.mrb[10].mxu1 %vm383_vm1, %v638_v59  ;;  %v1176_v24 = vpop.permute.xlu1 %1175 }
 0x391   :  { %v1174_v25 = vpop.permute.xlu0 %1173  ;;  %2743 = vmatprep.mubr.msk.f32.mxu1 %vm383_vm1, %v902_v62 }
 0x394   :  { %2744 = vmatmul.mubr.msk.f32.vlgmr.msra.gmra.mrb[12].mxu1 %vm383_vm1, %v904_v1  ;;  %v1457_v5 = vpop.permute.xlu1 %1456 }
 0x395   :  { %v1178_v4 = vpop.permute.xlu0 %1177  ;;  %2758 = vmatpush3.xpose.msk.msra.mxu1 %vm383_vm1, %v1180_v26  ;;  %2746 = vmatprep.mubr.msk.f32.mxu1 %vm383_vm1, %v906_v23 }
 0x396   :  { %2773 = vmatprep.subr.msk.mxu1 %vm383_vm1, %v1457_v5 }
 0x398   :  { %2747 = vmatmul.mubr.msk.f32.gmra.mrb[14].mxu1 %vm383_vm1, %v908_v12  ;;  %v1706_v7 = vpop.permute.xlu1 %1705 }
 0x399   :  { %v1714_v6 = vpop.permute.xlu0 %1713  ;;  %2759 = vmatprep.mubr.msk.f32.mxu1 %vm383_vm1, %v1172_v3 }
 0x39c   :  { %2760 = vmatmul.mubr.msk.f32.vlgmr.msra.gmra.mrb[16].mxu1 %vm383_vm1, %v1174_v25  ;;  %v1710_v9 = vpop.permute.xlu1 %1709 }
 0x39d   :  { %v1708_v8 = vpop.permute.xlu0 %1707  ;;  %2774 = vmatpush3.xpose.msk.msra.mxu1 %vm383_vm1, %v1457_v5  ;;  %2762 = vmatprep.mubr.msk.f32.mxu1 %vm383_vm1, %v1176_v24 }
 0x39e   :  { %2789 = vmatprep.subr.msk.mxu1 %vm383_vm1, %v1714_v6 }
 0x3a0   :  { %2763 = vmatmul.mubr.msk.f32.gmra.mrb[18].mxu1 %vm383_vm1, %v1178_v4  ;;  %v1983_v13 = vpop.permute.xlu1 %1982 }
 0x3a1   :  { %v1712_v11 = vpop.permute.xlu0 %1711  ;;  %2775 = vmatprep.mubr.msk.f32.mxu1 %vm383_vm1, %v3161_v10 }
 0x3a4   :  { %2776 = vmatmul.mubr.msk.f32.vlgmr.msra.gmra.mrb[20].mxu1 %vm383_vm1, %v3169_v18  ;;  %v1977_v15 = vpop.permute.xlu1 %1976 }
 0x3a5   :  { %v1975_v14 = vpop.permute.xlu0 %1974  ;;  %2790 = vmatpush3.xpose.msk.msra.mxu1 %vm383_vm1, %v1714_v6  ;;  %2778 = vmatprep.mubr.msk.f32.mxu1 %vm383_vm1, %v3186_v31 }
 0x3a6   :  { %2805 = vmatprep.subr.msk.mxu1 %vm383_vm1, %v1983_v13 }
 0x3a8   :  { %2779 = vmatmul.mubr.msk.f32.gmra.mrb[22].mxu1 %vm383_vm1, %v3198_v45  ;;  %v1981_v19 = vpop.permute.xlu1 %1980 }
 0x3a9   :  { %v1979_v17 = vpop.permute.xlu0 %1978  ;;  %2791 = vmatprep.mubr.msk.f32.mxu1 %vm383_vm1, %v1706_v7 }
 0x3ac   :  { %2792 = vmatmul.mubr.msk.f32.vlgmr.msra.gmra.mrb[24].mxu1 %vm383_vm1, %v1708_v8  ;;  %v2244_v18 = vpop.permute.xlu1 %2243 }
 0x3ad   :  { %v2252_v10 = vpop.permute.xlu0 %2251  ;;  %2806 = vmatpush3.xpose.msk.msra.mxu1 %vm383_vm1, %v1983_v13  ;;  %2794 = vmatprep.mubr.msk.f32.mxu1 %vm383_vm1, %v1710_v9 }
 0x3ae   :  { %2821 = vmatprep.subr.msk.mxu1 %vm383_vm1, %v2252_v10 }
 0x3b0   :  { %2795 = vmatmul.mubr.msk.f32.gmra.mrb[26].mxu1 %vm383_vm1, %v1712_v11  ;;  %v2248_v21 = vpop.permute.xlu1 %2247 }
 0x3b1   :  { %v2246_v31 = vpop.permute.xlu0 %2245  ;;  %2807 = vmatprep.mubr.msk.f32.mxu1 %vm383_vm1, %v1975_v14 }
 0x3b4   :  { %2808 = vmatmul.mubr.msk.f32.vlgmr.msra.gmra.mrb[28].mxu1 %vm383_vm1, %v1977_v15  ;;  %v3326_v28 = vpop.permute.xlu1 %1050 }
 0x3b5   :  { %v2250_v45 = vpop.permute.xlu0 %2249  ;;  %2822 = vmatpush3.xpose.msk.msra.mxu1 %vm383_vm1, %v2252_v10  ;;  %2810 = vmatprep.mubr.msk.f32.mxu1 %vm383_vm1, %v1979_v17 }
 0x3b8   :  { %2811 = vmatmul.mubr.msk.f32.gmra.mrb[30].mxu1 %vm383_vm1, %v1981_v19 }
 0x3b9   :  { %v781_v27 = vpop.permute.xlu0 %780  ;;  %2823 = vmatprep.mubr.msk.f32.mxu1 %vm383_vm1, %v2244_v18 }
 0x3ba   :  { %2733 = vmatprep.subr.mxu0 %v781_v27 }
 0x3bb   :  { %2734 = vmatpush3.msra.mxu0 %v781_v27 }
 0x3bc   :  { %2749 = vmatprep.subr.mxu0 %v3326_v28  ;;  %2824 = vmatmul.mubr.msk.f32.vlgmr.msra.gmra.mrb[32].mxu1 %vm383_vm1, %v2246_v31 }
 0x3bd   :  { %2826 = vmatprep.mubr.msk.f32.mxu1 %vm383_vm1, %v2248_v21 }
 0x3c0   :  { %2827 = vmatmul.mubr.msk.f32.gmra.mrb[34].mxu1 %vm383_vm1, %v2250_v45  ;;  %v3461_v45 = vpop.permute.xlu0 %1320 }
 0x456   :  { %v2721_v30 = vpop.f32.mrb[4].mxu1 }
 0x457   :  { %628 = vst.msk [vmem:[%s3810_s4 + $0x8] sm:$0xff] %vm383_vm1, %v2721_v30  ;;  %v608_v32 = vpop.f32.mrb[5].mxu1 }
 0x458   :  { %627 = vst.msk [vmem:[%s3810_s4] sm:$0xff] %vm383_vm1, %v608_v32 }
 0x45b   :  { %v2724_v33 = vpop.f32.mrb[6].mxu1 }
 0x45c   :  { %630 = vst.msk [vmem:[%s3810_s4 + $0x18] sm:$0xff] %vm383_vm1, %v2724_v33  ;;  %v618_v35 = vpop.f32.mrb[7].mxu1 }
 0x45d   :  { %629 = vst.msk [vmem:[%s3810_s4 + $0x10] sm:$0xff] %vm383_vm1, %v618_v35 }
 0x45f   :  { %v3349_v36 = vpop.f32.mrb[8].mxu1 }
 0x460   :  { %v3351_v37 = vpop.f32.mrb[9].mxu1  ;;  %v739_v38 = vsel %vm383_vm1, %v3349_v36, -inf }
 0x461   :  { %740 = vmax.xlane.f32.xlu0 %v739_v38  ;;  %v736_v39 = vsel %vm383_vm1, %v3351_v37, -inf }
 0x462   :  { %737 = vmax.xlane.f32.xlu1 %v736_v39 }
 0x463   :  { %v3357_v40 = vpop.f32.mrb[10].mxu1 }
 0x464   :  { %v3359_v41 = vpop.f32.mrb[11].mxu1  ;;  %v745_v42 = vsel %vm383_vm1, %v3357_v40, -inf }
 0x465   :  { %v742_v44 = vsel %vm383_vm1, %v3359_v41, -inf }
 0x466   :  { %746 = vmax.xlane.f32.xlu1 %v745_v42  ;;  %743 = vmax.xlane.f32.xlu0 %v742_v44 }
 0x467   :  { %v3365_v46 = vpop.f32.mrb[12].mxu1 }
 0x468   :  { %v3367_v47 = vpop.f32.mrb[13].mxu1  ;;  %v1009_v48 = vsel %vm383_vm1, %v3365_v46, -inf }
 0x469   :  { %v1006_v49 = vsel %vm383_vm1, %v3367_v47, -inf }
 0x46a   :  { %1010 = vmax.xlane.f32.xlu1 %v1009_v48  ;;  %1007 = vmax.xlane.f32.xlu0 %v1006_v49 }
 0x46b   :  { %v3373_v50 = vpop.f32.mrb[14].mxu1 }
 0x46c   :  { %v3375_v51 = vpop.f32.mrb[15].mxu1  ;;  %v1015_v52 = vsel %vm383_vm1, %v3373_v50, -inf }
 0x46d   :  { %v1012_v20 = vsel %vm383_vm1, %v3375_v51, -inf }
 0x46e   :  { %1016 = vmax.xlane.f32.xlu1 %v1015_v52  ;;  %1013 = vmax.xlane.f32.xlu0 %v1012_v20 }
 0x46f   :  { %v3381_v22 = vpop.f32.mrb[16].mxu1 }
 0x470   :  { %v3383_v29 = vpop.f32.mrb[17].mxu1  ;;  %v1279_v34 = vsel %vm383_vm1, %v3381_v22, -inf }
 0x471   :  { %v1276_v54 = vsel %vm383_vm1, %v3383_v29, -inf }
 0x472   :  { %1280 = vmax.xlane.f32.xlu1 %v1279_v34  ;;  %1277 = vmax.xlane.f32.xlu0 %v1276_v54 }
 0x473   :  { %v3389_v55 = vpop.f32.mrb[18].mxu1 }
 0x474   :  { %v3391_v56 = vpop.f32.mrb[19].mxu1  ;;  %v1285_v57 = vsel %vm383_vm1, %v3389_v55, -inf }
 0x475   :  { %v1282_v59 = vsel %vm383_vm1, %v3391_v56, -inf }
 0x476   :  { %1286 = vmax.xlane.f32.xlu1 %v1285_v57  ;;  %1283 = vmax.xlane.f32.xlu0 %v1282_v59 }
 0x477   :  { %v3397_v60 = vpop.f32.mrb[20].mxu1 }
 0x478   :  { %v3399_v61 = vpop.f32.mrb[21].mxu1  ;;  %v1560_v16 = vsel %vm383_vm1, %v3397_v60, -inf }
 0x479   :  { %v1557_v58 = vsel %vm383_vm1, %v3399_v61, -inf }
 0x47a   :  { %1561 = vmax.xlane.f32.xlu1 %v1560_v16  ;;  %1558 = vmax.xlane.f32.xlu0 %v1557_v58 }
 0x47b   :  { %v3405_v43 = vpop.f32.mrb[22].mxu1 }
 0x47c   :  { %v3407_v62 = vpop.f32.mrb[23].mxu1  ;;  %v1566_v63 = vsel %vm383_vm1, %v3405_v43, -inf }
 0x47d   :  { %v1563_v0 = vsel %vm383_vm1, %v3407_v62, -inf }
 0x47e   :  { %1567 = vmax.xlane.f32.xlu1 %v1566_v63  ;;  %1564 = vmax.xlane.f32.xlu0 %v1563_v0 }
 0x47f   :  { %v3413_v1 = vpop.f32.mrb[24].mxu1 }
 0x480   :  { %v3415_v2 = vpop.f32.mrb[25].mxu1  ;;  %v1813_v23 = vsel %vm383_vm1, %v3413_v1, -inf }
 0x481   :  { %v1810_v12 = vsel %vm383_vm1, %v3415_v2, -inf }
 0x482   :  { %1814 = vmax.xlane.f32.xlu1 %v1813_v23  ;;  %1811 = vmax.xlane.f32.xlu0 %v1810_v12 }
 0x483   :  { %v3421_v26 = vpop.f32.mrb[26].mxu1 }
 0x484   :  { %v3423_v3 = vpop.f32.mrb[27].mxu1  ;;  %v1819_v25 = vsel %vm383_vm1, %v3421_v26, -inf }
 0x485   :  { %v1816_v24 = vsel %vm383_vm1, %v3423_v3, -inf }
 0x486   :  { %1820 = vmax.xlane.f32.xlu1 %v1819_v25  ;;  %1817 = vmax.xlane.f32.xlu0 %v1816_v24 }
 0x487   :  { %v3429_v4 = vpop.f32.mrb[28].mxu1 }
 0x488   :  { %v3431_v5 = vpop.f32.mrb[29].mxu1  ;;  %v2082_v6 = vsel %vm383_vm1, %v3429_v4, -inf }
 0x489   :  { %v2079_v7 = vsel %vm383_vm1, %v3431_v5, -inf }
 0x48a   :  { %2083 = vmax.xlane.f32.xlu1 %v2082_v6  ;;  %2080 = vmax.xlane.f32.xlu0 %v2079_v7 }
 0x48b   :  { %v3437_v8 = vpop.f32.mrb[30].mxu1 }
 0x48c   :  { %v3439_v9 = vpop.f32.mrb[31].mxu1  ;;  %v2088_v11 = vsel %vm383_vm1, %v3437_v8, -inf }
 0x48d   :  { %v2085_v13 = vsel %vm383_vm1, %v3439_v9, -inf }
 0x48e   :  { %2089 = vmax.xlane.f32.xlu1 %v2088_v11  ;;  %2086 = vmax.xlane.f32.xlu0 %v2085_v13 }
 0x48f   :  { %v3445_v14 = vpop.f32.mrb[32].mxu1 }
 0x490   :  { %v3447_v15 = vpop.f32.mrb[33].mxu1  ;;  %v2351_v17 = vsel %vm383_vm1, %v3445_v14, -inf }
 0x491   :  { %v2348_v19 = vsel %vm383_vm1, %v3447_v15, -inf }
 0x492   :  { %2352 = vmax.xlane.f32.xlu1 %v2351_v17  ;;  %2349 = vmax.xlane.f32.xlu0 %v2348_v19 }
 0x493   :  { %v3453_v10 = vpop.f32.mrb[34].mxu1 }
 0x494   :  { %v3455_v18 = vpop.f32.mrb[35].mxu1  ;;  %v2357_v31 = vsel %vm383_vm1, %v3453_v10, -inf }
 0x495   :  { %v2354_v21 = vsel %vm383_vm1, %v3455_v18, -inf }
 0x496   :  { %2358 = vmax.xlane.f32.xlu1 %v2357_v31  ;;  %2355 = vmax.xlane.f32.xlu0 %v2354_v21 }
 0x4ee   :  { %v741_v27 = vpop.xlane.xlu0 %740 }
 0x4ef   :  { %v749_v30 = vsub.f32 %v3349_v36, %v741_v27  ;;  %v738_v32 = vpop.xlane.xlu1 %737 }
 0x4f0   :  { %v748_v33 = vsub.f32 %v3351_v37, %v738_v32 }
 0x4f1   :  { %v754_v35 = vmul.f32 1.442695, %v749_v30 }
 0x4f2   :  { %v752_v38 = vmul.f32 1.442695, %v748_v33 }
 0x4f3   :  { %2878 = vpow2.f32 %v754_v35  ;;  %v747_v39 = vpop.xlane.xlu1 %746  ;;  %v744_v42 = vpop.xlane.xlu0 %743 }
 0x4f4   :  { %2880 = vpow2.f32 %v752_v38  ;;  %v751_v44 = vsub.f32 %v3357_v40, %v747_v39  ;;  %v750_v48 = vsub.f32 %v3359_v41, %v744_v42 }
 0x4f6   :  { %v758_v49 = vmul.f32 1.442695, %v751_v44  ;;  %v756_v52 = vmul.f32 1.442695, %v750_v48 }
 0x4f7   :  { %v1011_v20 = vpop.xlane.xlu1 %1010  ;;  %v1008_v34 = vpop.xlane.xlu0 %1007 }
 0x4f8   :  { %2882 = vpow2.f32 %v758_v49  ;;  %v1019_v36 = vsub.f32 %v3365_v46, %v1011_v20  ;;  %v1018_v54 = vsub.f32 %v3367_v47, %v1008_v34 }
 0x4f9   :  { %2884 = vpow2.f32 %v756_v52 }
 0x4fa   :  { %v1024_v37 = vmul.f32 1.442695, %v1019_v36  ;;  %v1022_v57 = vmul.f32 1.442695, %v1018_v54 }
 0x4fb   :  { %v1017_v59 = vpop.xlane.xlu1 %1016  ;;  %v1014_v16 = vpop.xlane.xlu0 %1013 }
 0x4fc   :  { %2886 = vpow2.f32 %v1024_v37  ;;  %v1021_v58 = vsub.f32 %v3373_v50, %v1017_v59  ;;  %v1020_v40 = vsub.f32 %v3375_v51, %v1014_v16 }
 0x4fd   :  { %v3471_v41 = vpop.eup %2878  ;;  %2888 = vpow2.f32 %v1022_v57 }
 0x4fe   :  { %v3473_v63 = vpop.eup %2880  ;;  %v1028_v0 = vmul.f32 1.442695, %v1021_v58  ;;  %v1026_v23 = vmul.f32 1.442695, %v1020_v40  ;;  %v763_v46 = vsel %vm383_vm1, %v3471_v41, 0.0 }
 0x4ff   :  { %v1281_v47 = vpop.xlane.xlu1 %1280  ;;  %764 = vadd.xlane.f32.xlu1 %v763_v46  ;;  %v1278_v12 = vpop.xlane.xlu0 %1277  ;;  %v760_v25 = vsel %vm383_vm1, %v3473_v63, 0.0 }
 0x500   :  { %2890 = vpow2.f32 %v1028_v0  ;;  %v1289_v50 = vsub.f32 %v3381_v22, %v1281_v47  ;;  %v1288_v51 = vsub.f32 %v3383_v29, %v1278_v12  ;;  %761 = vadd.xlane.f32.xlu0 %v760_v25 }
 0x501   :  { %2892 = vpow2.f32 %v1026_v23 }
 0x502   :  { %v3481_v24 = vpop.eup %2882  ;;  %v1294_v6 = vmul.f32 1.442695, %v1289_v50  ;;  %v1292_v7 = vmul.f32 1.442695, %v1288_v51 }
 0x503   :  { %v3483_v11 = vpop.eup %2884  ;;  %v1287_v13 = vpop.xlane.xlu1 %1286  ;;  %v769_v19 = vsel %vm383_vm1, %v3481_v24, 0.0 }
 0x504   :  { %v1284_v17 = vpop.xlane.xlu0 %1283  ;;  %2894 = vpow2.f32 %v1294_v6  ;;  %v1291_v31 = vsub.f32 %v3389_v55, %v1287_v13  ;;  %770 = vadd.xlane.f32.xlu1 %v769_v19  ;;  %v766_v29 = vsel %vm383_vm1, %v3483_v11, 0.0 }
 0x505   :  { %v1290_v22 = vsub.f32 %v3391_v56, %v1284_v17  ;;  %2896 = vpow2.f32 %v1292_v7  ;;  %767 = vadd.xlane.f32.xlu0 %v766_v29 }
 0x506   :  { %v3491_v21 = vpop.eup %2886  ;;  %v1298_v27 = vmul.f32 1.442695, %v1291_v31 }
 0x507   :  { %v1296_v30 = vmul.f32 1.442695, %v1290_v22  ;;  %v3493_v32 = vpop.eup %2888  ;;  %v1562_v33 = vpop.xlane.xlu1 %1561  ;;  %v1033_v38 = vsel %vm383_vm1, %v3491_v21, 0.0 }
 0x508   :  { %v1559_v35 = vpop.xlane.xlu0 %1558  ;;  %2898 = vpow2.f32 %v1298_v27  ;;  %v1570_v55 = vsub.f32 %v3397_v60, %v1562_v33  ;;  %1034 = vadd.xlane.f32.xlu1 %v1033_v38  ;;  %v1030_v39 = vsel %vm383_vm1, %v3493_v32, 0.0 }
 0x509   :  { %v1569_v56 = vsub.f32 %v3399_v61, %v1559_v35  ;;  %2900 = vpow2.f32 %v1296_v30  ;;  %1031 = vadd.xlane.f32.xlu0 %v1030_v39 }
 0x50a   :  { %v3501_v42 = vpop.eup %2890  ;;  %v1575_v44 = vmul.f32 1.442695, %v1570_v55 }
 0x50b   :  { %v1573_v48 = vmul.f32 1.442695, %v1569_v56  ;;  %v3503_v49 = vpop.eup %2892  ;;  %v1568_v52 = vpop.xlane.xlu1 %1567  ;;  %v1039_v34 = vsel %vm383_vm1, %v3501_v42, 0.0 }
 0x50c   :  { %v1565_v20 = vpop.xlane.xlu0 %1564  ;;  %2902 = vpow2.f32 %v1575_v44  ;;  %v1572_v60 = vsub.f32 %v3405_v43, %v1568_v52  ;;  %1040 = vadd.xlane.f32.xlu1 %v1039_v34  ;;  %v1036_v36 = vsel %vm383_vm1, %v3503_v49, 0.0 }
 0x50d   :  { %v1571_v61 = vsub.f32 %v3407_v62, %v1565_v20  ;;  %2904 = vpow2.f32 %v1573_v48  ;;  %1037 = vadd.xlane.f32.xlu0 %v1036_v36 }
 0x50e   :  { %v3511_v54 = vpop.eup %2894  ;;  %v1579_v37 = vmul.f32 1.442695, %v1572_v60 }
 0x50f   :  { %v1577_v57 = vmul.f32 1.442695, %v1571_v61  ;;  %v3513_v59 = vpop.eup %2896  ;;  %v1815_v16 = vpop.xlane.xlu1 %1814  ;;  %v1303_v40 = vsel %vm383_vm1, %v3511_v54, 0.0 }
 0x510   :  { %v1812_v58 = vpop.xlane.xlu0 %1811  ;;  %2906 = vpow2.f32 %v1579_v37  ;;  %v1823_v43 = vsub.f32 %v3413_v1, %v1815_v16  ;;  %1304 = vadd.xlane.f32.xlu1 %v1303_v40  ;;  %v1300_v62 = vsel %vm383_vm1, %v3513_v59, 0.0 }
 0x511   :  { %1301 = vadd.xlane.f32.xlu0 %v1300_v62  ;;  %2908 = vpow2.f32 %v1577_v57  ;;  %v1822_v46 = vsub.f32 %v3415_v2, %v1812_v58 }
 0x512   :  { %v3520_v0 = vpop.eup %2898  ;;  %v1828_v23 = vmul.f32 1.442695, %v1823_v43 }
 0x513   :  { %v3523_v47 = vpop.eup %2900  ;;  %v1821_v12 = vpop.xlane.xlu1 %1820  ;;  %v1309_v50 = vsel %vm383_vm1, %v3520_v0, 0.0  ;;  %v1826_v7 = vmul.f32 1.442695, %v1822_v46 }
 0x514   :  { %v1818_v25 = vpop.xlane.xlu0 %1817  ;;  %1310 = vadd.xlane.f32.xlu1 %v1309_v50  ;;  %v1306_v51 = vsel %vm383_vm1, %v3523_v47, 0.0  ;;  %2910 = vpow2.f32 %v1828_v23  ;;  %v1825_v2 = vsub.f32 %v3421_v26, %v1821_v12 }
 0x515   :  { %v1824_v1 = vsub.f32 %v3423_v3, %v1818_v25  ;;  %1307 = vadd.xlane.f32.xlu0 %v1306_v51 }
 0x516   :  { %v3530_v6 = vpop.eup %2902  ;;  %v1832_v26 = vmul.f32 1.442695, %v1825_v2 }
 0x517   :  { %v1830_v13 = vmul.f32 1.442695, %v1824_v1  ;;  %v3533_v17 = vpop.eup %2904  ;;  %v2084_v19 = vpop.xlane.xlu1 %2083  ;;  %v1584_v22 = vsel %vm383_vm1, %v3530_v6, 0.0 }
 0x518   :  { %v2081_v31 = vpop.xlane.xlu0 %2080  ;;  %v2092_v3 = vsub.f32 %v3429_v4, %v2084_v19  ;;  %1585 = vadd.xlane.f32.xlu1 %v1584_v22  ;;  %v1581_v27 = vsel %vm383_vm1, %v3533_v17, 0.0 }
 0x519   :  { %v2091_v29 = vsub.f32 %v3431_v5, %v2081_v31  ;;  %2912 = vpow2.f32 %v1830_v13  ;;  %1582 = vadd.xlane.f32.xlu0 %v1581_v27 }
 0x51a   :  { %v3541_v30 = vpop.eup %2906  ;;  %2914 = vpow2.f32 %v1826_v7  ;;  %v2097_v33 = vmul.f32 1.442695, %v2092_v3 }
 0x51b   :  { %v2095_v35 = vmul.f32 1.442695, %v2091_v29  ;;  %v2090_v38 = vpop.xlane.xlu1 %2089  ;;  %v1590_v56 = vsel %vm383_vm1, %v3541_v30, 0.0  ;;  %v3545_v4 = vpop.eup %2908 }
 0x51c   :  { %v2087_v55 = vpop.xlane.xlu0 %2086  ;;  %2916 = vpow2.f32 %v2097_v33  ;;  %v2094_v5 = vsub.f32 %v3437_v8, %v2090_v38  ;;  %1591 = vadd.xlane.f32.xlu1 %v1590_v56  ;;  %v1587_v52 = vsel %vm383_vm1, %v3545_v4, 0.0 }
 0x51d   :  { %2918 = vpow2.f32 %v1832_v26  ;;  %v2093_v44 = vsub.f32 %v3439_v9, %v2087_v55 }
 0x51e   :  { %v2101_v39 = vmul.f32 1.442695, %v2094_v5  ;;  %2920 = vpow2.f32 %v2095_v35  ;;  %v3551_v20 = vpop.eup %2910 }
 0x51f   :  { %v2353_v48 = vpop.xlane.xlu1 %2352  ;;  %v2099_v34 = vmul.f32 1.442695, %v2093_v44  ;;  %v1837_v36 = vsel %vm383_vm1, %v3551_v20, 0.0 }
 0x520   :  { %1588 = vadd.xlane.f32.xlu1 %v1587_v52  ;;  %2922 = vpow2.f32 %v2101_v39  ;;  %v2361_v60 = vsub.f32 %v3445_v14, %v2353_v48  ;;  %v2350_v8 = vpop.xlane.xlu0 %2349 }
 0x521   :  { %2924 = vpow2.f32 %v2099_v34  ;;  %v2360_v58 = vsub.f32 %v3447_v15, %v2350_v8 }
 0x522   :  { %v2366_v16 = vmul.f32 1.442695, %v2361_v60 }
 0x523   :  { %v3554_v61 = vpop.eup %2912  ;;  %v2364_v23 = vmul.f32 1.442695, %v2360_v58  ;;  %v2359_v19 = vpop.xlane.xlu1 %2358 }
 0x524   :  { %v3558_v37 = vpop.eup %2914  ;;  %1838 = vadd.xlane.f32.xlu1 %v1837_v36  ;;  %v1840_v9 = vsel %vm383_vm1, %v3554_v61, 0.0  ;;  %2926 = vpow2.f32 %v2366_v16  ;;  %v2363_v31 = vsub.f32 %v3453_v10, %v2359_v19  ;;  %v2356_v3 = vpop.xlane.xlu0 %2355 }
 0x525   :  { %1841 = vadd.xlane.f32.xlu0 %v1840_v9  ;;  %v1834_v14 = vsel %vm383_vm1, %v3558_v37, 0.0  ;;  %2928 = vpow2.f32 %v2364_v23  ;;  %v2362_v27 = vsub.f32 %v3455_v18, %v2356_v3 }
 0x526   :  { %v3562_v57 = vpop.eup %2916  ;;  %v2370_v22 = vmul.f32 1.442695, %v2363_v31 }
 0x527   :  { %v2106_v40 = vsel %vm383_vm1, %v3562_v57, 0.0  ;;  %v3569_v43 = vpop.eup %2918  ;;  %v2368_v33 = vmul.f32 1.442695, %v2362_v27 }
 0x528   :  { %1835 = vadd.xlane.f32.xlu1 %v1834_v14  ;;  %v3571_v62 = vpop.eup %2920  ;;  %v1843_v46 = vsel %vm383_vm1, %v3569_v43, 0.0  ;;  %2930 = vpow2.f32 %v2370_v22 }
 0x529   :  { %2107 = vadd.xlane.f32.xlu0 %v2106_v40  ;;  %v2103_v15 = vsel %vm383_vm1, %v3571_v62, 0.0  ;;  %2932 = vpow2.f32 %v2368_v33 }
 0x52a   :  { %v3575_v12 = vpop.eup %2922 }
 0x52b   :  { %v2112_v25 = vsel %vm383_vm1, %v3575_v12, 0.0  ;;  %v3581_v50 = vpop.eup %2924 }
 0x52c   :  { %1844 = vadd.xlane.f32.xlu1 %v1843_v46  ;;  %v2109_v1 = vsel %vm383_vm1, %v3581_v50, 0.0 }
 0x52d   :  { %2104 = vadd.xlane.f32.xlu0 %v2103_v15 }
 0x52e   :  { %v3585_v51 = vpop.eup %2926 }
 0x52f   :  { %v2375_v7 = vsel %vm383_vm1, %v3585_v51, 0.0  ;;  %v3589_v2 = vpop.eup %2928 }
 0x530   :  { %2113 = vadd.xlane.f32.xlu1 %v2112_v25  ;;  %v2372_v13 = vsel %vm383_vm1, %v3589_v2, 0.0 }
 0x532   :  { %v3600_v29 = vpop.eup %2930 }
 0x533   :  { %v2381_v26 = vsel %vm383_vm1, %v3600_v29, 0.0  ;;  %v3605_v10 = vpop.eup %2932 }
 0x534   :  { %2110 = vadd.xlane.f32.xlu1 %v2109_v1  ;;  %v2378_v35 = vsel %vm383_vm1, %v3605_v10, 0.0 }
 0x538   :  { %2376 = vadd.xlane.f32.xlu1 %v2375_v7 }
 0x53c   :  { %2373 = vadd.xlane.f32.xlu1 %v2372_v13 }
 0x543   :  { %1601 = vrot.lane.b32.xlu0 %v3233_v53, %s2994_s30 }
 0x54d   :  { %1854 = vrot.lane.b32.xlu1 %v3233_v53, %s3000_s9 }
 0x551   :  { %2123 = vrot.lane.b32.xlu1 %v3233_v53, %s2999_s8 }
 0x562   :  { %2382 = vadd.xlane.f32.xlu0 %v2381_v26 }
 0x575   :  { %2379 = vadd.xlane.f32.xlu1 %v2378_v35 }
 0x586   :  { %2392 = vrot.lane.b32.xlu1 %v3233_v53, %s3001_s10 }
 0x58c   :  { %v765_v38 = vpop.xlane.xlu1 %764 }
 0x58d   :  { %2934 = vrcp.f32 %v765_v38  ;;  %v762_v55 = vpop.xlane.xlu0 %761 }
 0x58e   :  { %2936 = vrcp.f32 %v762_v55 }
 0x591   :  { %v771_v18 = vpop.xlane.xlu1 %770 }
 0x592   :  { %2938 = vrcp.f32 %v771_v18  ;;  %v768_v56 = vpop.xlane.xlu0 %767 }
 0x593   :  { %2940 = vrcp.f32 %v768_v56 }
 0x595   :  { %v1035_v5 = vpop.xlane.xlu1 %1034 }
 0x596   :  { %2942 = vrcp.f32 %v1035_v5  ;;  %v1032_v39 = vpop.xlane.xlu0 %1031 }
 0x597   :  { %v2935_v44 = vpop.eup %2934  ;;  %2944 = vrcp.f32 %v1032_v39 }
 0x598   :  { %v2937_v48 = vpop.eup %2936  ;;  %v777_v60 = vmul.f32 %v2935_v44, %v3471_v41 }
 0x599   :  { %v1041_v52 = vpop.xlane.xlu1 %1040  ;;  %v776_v34 = vmul.f32 %v2937_v48, %v3473_v63 }
 0x59a   :  { %2946 = vrcp.f32 %v1041_v52  ;;  %v1038_v53 = vpop.xlane.xlu0 %1037 }
 0x59b   :  { %2948 = vrcp.f32 %v1038_v53  ;;  %2735 = vmatprep.mubr.msk.f32.mxu0 %vm383_vm1, %v776_v34 }
 0x59c   :  { %v2939_v8 = vpop.eup %2938  ;;  %2736 = vmatmul.mubr.msk.f32.vlgmr.msra.gmra.mrb[8].mxu0 %vm383_vm1, %v777_v60 }
 0x59d   :  { %v2941_v36 = vpop.eup %2940  ;;  %2750 = vmatpush3.msra.mxu0 %v3326_v28  ;;  %v1305_v9 = vpop.xlane.xlu1 %1304  ;;  %v779_v16 = vmul.f32 %v2939_v8, %v3481_v24 }
 0x59e   :  { %2950 = vrcp.f32 %v1305_v9  ;;  %2765 = vmatprep.subr.mxu0 %v3461_v45  ;;  %v1302_v63 = vpop.xlane.xlu0 %1301  ;;  %v778_v41 = vmul.f32 %v2941_v36, %v3483_v11 }
 0x59f   :  { %2952 = vrcp.f32 %v1302_v63 }
 0x5a0   :  { %v2943_v58 = vpop.eup %2942  ;;  %2738 = vmatprep.mubr.msk.f32.mxu0 %vm383_vm1, %v778_v41 }
 0x5a1   :  { %v2945_v14 = vpop.eup %2944  ;;  %v1047_v40 = vmul.f32 %v2943_v58, %v3491_v21  ;;  %2739 = vmatmul.mubr.msk.f32.gmra.mrb[10].mxu0 %vm383_vm1, %v779_v16  ;;  %v1311_v23 = vpop.xlane.xlu1 %1310 }
 0x5a2   :  { %2954 = vrcp.f32 %v1311_v23  ;;  %v1308_v28 = vpop.xlane.xlu0 %1307  ;;  %v1046_v24 = vmul.f32 %v2945_v14, %v3493_v32 }
 0x5a3   :  { %2956 = vrcp.f32 %v1308_v28 }
 0x5a4   :  { %v2947_v46 = vpop.eup %2946  ;;  %2751 = vmatprep.mubr.msk.f32.mxu0 %vm383_vm1, %v1046_v24 }
 0x5a5   :  { %v2949_v15 = vpop.eup %2948  ;;  %2752 = vmatmul.mubr.msk.f32.vlgmr.msra.gmra.mrb[12].mxu0 %vm383_vm1, %v1047_v40  ;;  %v1586_v11 = vpop.xlane.xlu1 %1585  ;;  %v1049_v25 = vmul.f32 %v2947_v46, %v3501_v42 }
 0x5a6   :  { %2766 = vmatpush3.msra.mxu0 %v3461_v45  ;;  %v1583_v21 = vpop.xlane.xlu0 %1582  ;;  %v1048_v1 = vmul.f32 %v2949_v15, %v3503_v49 }
 0x5a7   :  { %2958 = vrcp.f32 %v1583_v21 }
 0x5a8   :  { %v2951_v7 = vpop.eup %2950  ;;  %2754 = vmatprep.mubr.msk.f32.mxu0 %vm383_vm1, %v1048_v1  ;;  %2960 = vrcp.f32 %v1586_v11 }
 0x5a9   :  { %v2953_v32 = vpop.eup %2952  ;;  %v1317_v13 = vmul.f32 %v2951_v7, %v3511_v54  ;;  %2755 = vmatmul.mubr.msk.f32.gmra.mrb[14].mxu0 %vm383_vm1, %v1049_v25  ;;  %v1592_v19 = vpop.xlane.xlu1 %1591 }
 0x5aa   :  { %v1316_v31 = vmul.f32 %v2953_v32, %v3513_v59 }
 0x5ac   :  { %v2955_v22 = vpop.eup %2954  ;;  %2767 = vmatprep.mubr.msk.f32.mxu0 %vm383_vm1, %v1316_v31 }
 0x5ad   :  { %v2957_v42 = vpop.eup %2956  ;;  %2768 = vmatmul.mubr.msk.f32.vlgmr.msra.gmra.mrb[16].mxu0 %vm383_vm1, %v1317_v13  ;;  %v1589_v45 = vpop.xlane.xlu1 %1588  ;;  %v1319_v49 = vmul.f32 %v2955_v22, %v3520_v0 }
 0x5ae   :  { %v1318_v3 = vmul.f32 %v2957_v42, %v3523_v47  ;;  %2962 = vrcp.f32 %v1589_v45 }
 0x5af   :  { %2964 = vrcp.f32 %v1592_v19 }
 0x5b0   :  { %2770 = vmatprep.mubr.msk.f32.mxu0 %vm383_vm1, %v1318_v3 }
 0x5b1   :  { %v2959_v27 = vpop.eup %2958  ;;  %2771 = vmatmul.mubr.msk.f32.gmra.mrb[18].mxu0 %vm383_vm1, %v1319_v49  ;;  %v1839_v54 = vpop.xlane.xlu1 %1838 }
 0x5b2   :  { %v1842_v26 = vpop.xlane.xlu0 %1841  ;;  %v1597_v59 = vmul.f32 %v2959_v27, %v3533_v17  ;;  %v2961_v47 = vpop.eup %2960 }
 0x5b3   :  { %v1598_v5 = vmul.f32 %v2961_v47, %v3530_v6 }
 0x5b4   :  { %2783 = vmatprep.mubr.msk.f32.mxu0 %vm383_vm1, %v1597_v59 }
 0x5b5   :  { %v1836_v33 = vpop.xlane.xlu1 %1835 }
 0x5b6   :  { %v2108_v35 = vpop.xlane.xlu0 %2107  ;;  %2966 = vrcp.f32 %v1836_v33 }
 0x5b7   :  { %2968 = vrcp.f32 %v1839_v54 }
 0x5b8   :  { %v2963_v55 = vpop.eup %2962  ;;  %2970 = vrcp.f32 %v1842_v26 }
 0x5b9   :  { %v1845_v0 = vpop.xlane.xlu1 %1844  ;;  %v2965_v39 = vpop.eup %2964  ;;  %v1599_v17 = vmul.f32 %v2963_v55, %v3545_v4 }
 0x5ba   :  { %v2105_v38 = vpop.xlane.xlu0 %2104  ;;  %v1600_v52 = vmul.f32 %v2965_v39, %v3541_v30  ;;  %2972 = vrcp.f32 %v1845_v0 }
 0x5bb   :  { %2974 = vrcp.f32 %v2105_v38 }
 0x5bc   :  { %2976 = vrcp.f32 %v2108_v35 }
 0x5bd   :  { %v2114_v18 = vpop.xlane.xlu1 %2113 }
 0x5be   :  { %v1602_v56 = vpop.permute.xlu0 %1601 }
 0x5bf   :  { %2781 = vmatprep.subr.mxu0 %v1602_v56 }
 0x5c0   :  { %2782 = vmatpush3.msra.mxu0 %v1602_v56  ;;  %v2967_v44 = vpop.eup %2966 }
 0x5c1   :  { %2784 = vmatmul.mubr.msk.f32.vlgmr.msra.gmra.mrb[20].mxu0 %vm383_vm1, %v1598_v5  ;;  %v2111_v48 = vpop.xlane.xlu1 %2110  ;;  %v1850_v34 = vmul.f32 %v2967_v44, %v3558_v37  ;;  %v2969_v60 = vpop.eup %2968 }
 0x5c2   :  { %2786 = vmatprep.mubr.msk.f32.mxu0 %vm383_vm1, %v1599_v17  ;;  %2978 = vrcp.f32 %v2111_v48  ;;  %v2971_v53 = vpop.eup %2970  ;;  %v1851_v36 = vmul.f32 %v2969_v60, %v3551_v20 }
 0x5c3   :  { %2980 = vrcp.f32 %v2114_v18  ;;  %v1852_v37 = vmul.f32 %v2971_v53, %v3554_v61 }
 0x5c4   :  { %v2973_v30 = vpop.eup %2972 }
 0x5c5   :  { %2787 = vmatmul.mubr.msk.f32.gmra.mrb[22].mxu0 %vm383_vm1, %v1600_v52  ;;  %v2377_v6 = vpop.xlane.xlu1 %2376  ;;  %v2975_v9 = vpop.eup %2974  ;;  %v1853_v63 = vmul.f32 %v2973_v30, %v3569_v43 }
 0x5c6   :  { %2799 = vmatprep.mubr.msk.f32.mxu0 %vm383_vm1, %v1850_v34  ;;  %v2977_v41 = vpop.eup %2976  ;;  %v2119_v58 = vmul.f32 %v2975_v9, %v3571_v62 }
 0x5c7   :  { %v2120_v61 = vmul.f32 %v2977_v41, %v3562_v57 }
 0x5c9   :  { %v2374_v4 = vpop.xlane.xlu1 %2373 }
 0x5ca   :  { %2982 = vrcp.f32 %v2374_v4 }
 0x5cb   :  { %2984 = vrcp.f32 %v2377_v6 }
 0x5cc   :  { %v2979_v20 = vpop.eup %2978 }
 0x5cd   :  { %v1855_v8 = vpop.permute.xlu1 %1854  ;;  %v2981_v14 = vpop.eup %2980  ;;  %v2121_v40 = vmul.f32 %v2979_v20, %v3581_v50 }
 0x5ce   :  { %2797 = vmatprep.subr.mxu0 %v1855_v8  ;;  %v2122_v43 = vmul.f32 %v2981_v14, %v3575_v12 }
 0x5cf   :  { %2798 = vmatpush3.msra.mxu0 %v1855_v8 }
 0x5d0   :  { %2800 = vmatmul.mubr.msk.f32.vlgmr.msra.gmra.mrb[24].mxu0 %vm383_vm1, %v1851_v36 }
 0x5d1   :  { %v2124_v16 = vpop.permute.xlu1 %2123  ;;  %2802 = vmatprep.mubr.msk.f32.mxu0 %vm383_vm1, %v1852_v37 }
 0x5d2   :  { %2813 = vmatprep.subr.mxu0 %v2124_v16 }
 0x5d3   :  { %2814 = vmatpush3.msra.mxu0 %v2124_v16 }
 0x5d4   :  { %2803 = vmatmul.mubr.msk.f32.gmra.mrb[26].mxu0 %vm383_vm1, %v1853_v63  ;;  %v2983_v23 = vpop.eup %2982 }
 0x5d5   :  { %2815 = vmatprep.mubr.msk.f32.mxu0 %vm383_vm1, %v2119_v58  ;;  %v2388_v28 = vmul.f32 %v2983_v23, %v3589_v2  ;;  %v2985_v24 = vpop.eup %2984 }
 0x5d6   :  { %v2389_v46 = vmul.f32 %v2985_v24, %v3585_v51 }
 0x5d8   :  { %2816 = vmatmul.mubr.msk.f32.vlgmr.msra.gmra.mrb[28].mxu0 %vm383_vm1, %v2120_v61 }
 0x5d9   :  { %2818 = vmatprep.mubr.msk.f32.mxu0 %vm383_vm1, %v2121_v40 }
 0x5dc   :  { %2819 = vmatmul.mubr.msk.f32.gmra.mrb[30].mxu0 %vm383_vm1, %v2122_v43 }
 0x5dd   :  { %2831 = vmatprep.mubr.msk.f32.mxu0 %vm383_vm1, %v2388_v28 }
 0x5ef   :  { %v2383_v62 = vpop.xlane.xlu0 %2382 }
 0x5f0   :  { %2986 = vrcp.f32 %v2383_v62 }
 0x5fa   :  { %v2987_v12 = vpop.eup %2986 }
 0x5fb   :  { %v2391_v11 = vmul.f32 %v2987_v12, %v3600_v29 }
 0x602   :  { %v2380_v57 = vpop.xlane.xlu1 %2379 }
 0x603   :  { %2988 = vrcp.f32 %v2380_v57 }
 0x606   :  { %v2393_v50 = vpop.permute.xlu1 %2392 }
 0x607   :  { %2829 = vmatprep.subr.mxu0 %v2393_v50 }
 0x608   :  { %2830 = vmatpush3.msra.mxu0 %v2393_v50 }
 0x609   :  { %2832 = vmatmul.mubr.msk.f32.vlgmr.msra.gmra.mrb[32].mxu0 %vm383_vm1, %v2389_v46 }
 0x60d   :  { %v2989_v15 = vpop.eup %2988 }
 0x60e   :  { %v2390_v2 = vmul.f32 %v2989_v15, %v3605_v10 }
 0x610   :  { %2834 = vmatprep.mubr.msk.f32.mxu0 %vm383_vm1, %v2390_v2 }
 0x611   :  { %2835 = vmatmul.mubr.msk.f32.gmra.mrb[34].mxu0 %vm383_vm1, %v2391_v11 }
 0x66f   :  { %v2737_v25 = vpop.f32.mrb[8].mxu0 }
 0x670   :  { %886 = vrot.lane.b32.xlu0 %v2737_v25, %s3002_s18  ;;  %v861_v21 = vpop.f32.mrb[9].mxu0 }
 0x671   :  { %884 = vrot.lane.b32.xlu1 %v861_v21, %s3002_s18 }
 0x674   :  { %v2740_v51 = vpop.f32.mrb[10].mxu0 }
 0x675   :  { %v871_v1 = vpop.f32.mrb[11].mxu0  ;;  %890 = vrot.lane.b32.xlu1 %v2740_v51, %s3002_s18 }
 0x678   :  { %v2753_v7 = vpop.f32.mrb[12].mxu0 }
 0x679   :  { %v1131_v32 = vpop.f32.mrb[13].mxu0  ;;  %888 = vrot.lane.b32.xlu1 %v871_v1, %s3002_s18 }
 0x67a   :  { %1154 = vrot.lane.b32.xlu0 %v1131_v32, %s3003_s19 }
 0x67c   :  { %v2756_v29 = vpop.f32.mrb[14].mxu0 }
 0x67d   :  { %v1141_v10 = vpop.f32.mrb[15].mxu0  ;;  %1156 = vrot.lane.b32.xlu1 %v2753_v7, %s3003_s19 }
 0x67e   :  { %1158 = vrot.lane.b32.xlu0 %v1141_v10, %s3003_s19 }
 0x680   :  { %v2769_v13 = vpop.f32.mrb[16].mxu0 }
 0x681   :  { %v1401_v19 = vpop.f32.mrb[17].mxu0  ;;  %1160 = vrot.lane.b32.xlu1 %v2756_v29, %s3003_s19 }
 0x682   :  { %1424 = vrot.lane.b32.xlu0 %v1401_v19, %s3004_s20 }
 0x684   :  { %v2772_v31 = vpop.f32.mrb[18].mxu0 }
 0x685   :  { %v1411_v22 = vpop.f32.mrb[19].mxu0  ;;  %1426 = vrot.lane.b32.xlu1 %v2769_v13, %s3004_s20 }
 0x686   :  { %1428 = vrot.lane.b32.xlu0 %v1411_v22, %s3004_s20 }
 0x689   :  { %1430 = vrot.lane.b32.xlu1 %v2772_v31, %s3004_s20 }
 0x694   :  { %v2785_v42 = vpop.f32.mrb[20].mxu0 }
 0x695   :  { %1702 = vst.msk [vmem:[%s3810_s4 + $0x28] sm:$0xff] %vm383_vm1, %v2785_v42  ;;  %v1682_v45 = vpop.f32.mrb[21].mxu0 }
 0x696   :  { %1701 = vst.msk [vmem:[%s3810_s4 + $0x20] sm:$0xff] %vm383_vm1, %v1682_v45 }
 0x698   :  { %v2788_v49 = vpop.f32.mrb[22].mxu0 }
 0x699   :  { %1704 = vst.msk [vmem:[%s3810_s4 + $0x38] sm:$0xff] %vm383_vm1, %v2788_v49  ;;  %v1692_v3 = vpop.f32.mrb[23].mxu0 }
 0x69a   :  { %1703 = vst.msk [vmem:[%s3810_s4 + $0x30] sm:$0xff] %vm383_vm1, %v1692_v3 }
 0x6a3   :  { %v2801_v27 = vpop.f32.mrb[24].mxu0 }
 0x6a4   :  { %1960 = vrot.lane.b32.xlu1 %v2801_v27, %s3002_s18  ;;  %v1935_v54 = vpop.f32.mrb[25].mxu0 }
 0x6a7   :  { %v2804_v26 = vpop.f32.mrb[26].mxu0 }
 0x6a8   :  { %1958 = vrot.lane.b32.xlu1 %v1935_v54, %s3002_s18  ;;  %v1945_v59 = vpop.f32.mrb[27].mxu0 }
 0x6ab   :  { %v2817_v33 = vpop.f32.mrb[28].mxu0 }
 0x6ac   :  { %1964 = vrot.lane.b32.xlu1 %v2804_v26, %s3002_s18  ;;  %v2204_v35 = vpop.f32.mrb[29].mxu0 }
 0x6ad   :  { %2227 = vrot.lane.b32.xlu0 %v2204_v35, %s3003_s19 }
 0x6af   :  { %v2820_v0 = vpop.f32.mrb[30].mxu0 }
 0x6b0   :  { %1962 = vrot.lane.b32.xlu1 %v1945_v59, %s3002_s18  ;;  %v2214_v38 = vpop.f32.mrb[31].mxu0 }
 0x6b1   :  { %2231 = vrot.lane.b32.xlu0 %v2214_v38, %s3003_s19 }
 0x6b4   :  { %2229 = vrot.lane.b32.xlu1 %v2817_v33, %s3003_s19 }
 0x6b8   :  { %2233 = vrot.lane.b32.xlu1 %v2820_v0, %s3003_s19 }
 0x6dc   :  { %v2833_v47 = vpop.f32.mrb[32].mxu0 }
 0x6dd   :  { %2498 = vrot.lane.b32.xlu1 %v2833_v47, %s3004_s20  ;;  %v2473_v55 = vpop.f32.mrb[33].mxu0 }
 0x6de   :  { %2496 = vrot.lane.b32.xlu0 %v2473_v55, %s3004_s20 }
 0x6e2   :  { %v887_v18 = vpop.permute.xlu0 %886 }
 0x6e3   :  { %898 = vst.msk [vmem:[%s3810_s4 + $0x8] sm:$0xff] %vm896_vm10, %v887_v18  ;;  %v885_v56 = vpop.permute.xlu1 %884 }
 0x6e4   :  { %897 = vst.msk [vmem:[%s3810_s4] sm:$0xff] %vm896_vm10, %v885_v56  ;;  %v2836_v5 = vpop.f32.mrb[34].mxu0 }
 0x6e5   :  { %2502 = vrot.lane.b32.xlu1 %v2836_v5, %s3004_s20  ;;  %v2483_v39 = vpop.f32.mrb[35].mxu0 }
 0x6e6   :  { %2500 = vrot.lane.b32.xlu0 %v2483_v39, %s3004_s20 }
 0x6e7   :  { %v891_v17 = vpop.permute.xlu1 %890 }
 0x6e8   :  { %900 = vst.msk [vmem:[%s3810_s4 + $0x18] sm:$0xff] %vm896_vm10, %v891_v17 }
 0x6eb   :  { %v889_v44 = vpop.permute.xlu1 %888 }
 0x6ec   :  { %899 = vst.msk [vmem:[%s3810_s4 + $0x10] sm:$0xff] %vm896_vm10, %v889_v44  ;;  %v1155_v48 = vpop.permute.xlu0 %1154 }
 0x6ed   :  { %1167 = vst.msk [vmem:[%s3810_s4] sm:$0xff] %vm1166_vm11, %v1155_v48 }
 0x6ef   :  { %v1157_v52 = vpop.permute.xlu1 %1156 }
 0x6f0   :  { %1168 = vst.msk [vmem:[%s3810_s4 + $0x8] sm:$0xff] %vm1166_vm11, %v1157_v52  ;;  %v1159_v34 = vpop.permute.xlu0 %1158 }
 0x6f1   :  { %1169 = vst.msk [vmem:[%s3810_s4 + $0x10] sm:$0xff] %vm1166_vm11, %v1159_v34 }
 0x6f3   :  { %v1161_v6 = vpop.permute.xlu1 %1160 }
 0x6f4   :  { %1170 = vst.msk [vmem:[%s3810_s4 + $0x18] sm:$0xff] %vm1166_vm11, %v1161_v6  ;;  %v1425_v4 = vpop.permute.xlu0 %1424 }
 0x6f5   :  { %1437 = vst.msk [vmem:[%s3810_s4] sm:$0xff] %vm1436_vm12, %v1425_v4 }
 0x6f7   :  { %v1427_v60 = vpop.permute.xlu1 %1426 }
 0x6f8   :  { %1438 = vst.msk [vmem:[%s3810_s4 + $0x8] sm:$0xff] %vm1436_vm12, %v1427_v60  ;;  %v1429_v53 = vpop.permute.xlu0 %1428 }
 0x6f9   :  { %1439 = vst.msk [vmem:[%s3810_s4 + $0x10] sm:$0xff] %vm1436_vm12, %v1429_v53 }
 0x6fb   :  { %v1431_v8 = vpop.permute.xlu1 %1430 }
 0x6fc   :  { %1440 = vst.msk [vmem:[%s3810_s4 + $0x18] sm:$0xff] %vm1436_vm12, %v1431_v8 }
 0x716   :  { %v1961_v36 = vpop.permute.xlu1 %1960 }
 0x717   :  { %1971 = vst.msk [vmem:[%s3810_s4 + $0x28] sm:$0xff] %vm896_vm10, %v1961_v36 }
 0x71a   :  { %v1959_v30 = vpop.permute.xlu1 %1958 }
 0x71b   :  { %1970 = vst.msk [vmem:[%s3810_s4 + $0x20] sm:$0xff] %vm896_vm10, %v1959_v30 }
 0x71e   :  { %v1965_v37 = vpop.permute.xlu1 %1964 }
 0x71f   :  { %1973 = vst.msk [vmem:[%s3810_s4 + $0x38] sm:$0xff] %vm896_vm10, %v1965_v37  ;;  %v2228_v9 = vpop.permute.xlu0 %2227 }
 0x720   :  { %2239 = vst.msk [vmem:[%s3810_s4 + $0x20] sm:$0xff] %vm1166_vm11, %v2228_v9 }
 0x722   :  { %v1963_v16 = vpop.permute.xlu1 %1962 }
 0x723   :  { %1972 = vst.msk [vmem:[%s3810_s4 + $0x30] sm:$0xff] %vm896_vm10, %v1963_v16  ;;  %v2232_v63 = vpop.permute.xlu0 %2231 }
 0x724   :  { %2241 = vst.msk [vmem:[%s3810_s4 + $0x30] sm:$0xff] %vm1166_vm11, %v2232_v63 }
 0x726   :  { %v2230_v41 = vpop.permute.xlu1 %2229 }
 0x727   :  { %2240 = vst.msk [vmem:[%s3810_s4 + $0x28] sm:$0xff] %vm1166_vm11, %v2230_v41 }
 0x72a   :  { %v2234_v58 = vpop.permute.xlu1 %2233 }
 0x72b   :  { %2242 = vst.msk [vmem:[%s3810_s4 + $0x38] sm:$0xff] %vm1166_vm11, %v2234_v58 }
 0x74f   :  { %v2499_v20 = vpop.permute.xlu1 %2498 }
 0x750   :  { %2509 = vst.msk [vmem:[%s3810_s4 + $0x28] sm:$0xff] %vm1436_vm12, %v2499_v20  ;;  %v2497_v61 = vpop.permute.xlu0 %2496 }
 0x751   :  { %2508 = vst.msk [vmem:[%s3810_s4 + $0x20] sm:$0xff] %vm1436_vm12, %v2497_v61 }
 0x757   :  { %v2503_v14 = vpop.permute.xlu1 %2502 }
 0x758   :  { %2511 = vst.msk [vmem:[%s3810_s4 + $0x38] sm:$0xff] %vm1436_vm12, %v2503_v14  ;;  %v2501_v40 = vpop.permute.xlu0 %2500 }
 0x759   :  { %2510 = vst.msk [vmem:[%s3810_s4 + $0x30] sm:$0xff] %vm1436_vm12, %v2501_v40 }

</bundles_post_ra>
